<compile_context>
chip_gen: v7x
topology: tpu7x:2x2x1
jax: 0.10.0
libtpu: 0.0.40
codegen_flags: <defaults>
</compile_context>

<pallas_src>
import math
import functools

import jax
import jax.numpy as jnp
from jax.experimental import pallas as pl
from jax.experimental.pallas import tpu as pltpu  # noqa: F401  (TPU backend)

# ---- BytePairEncoding constants (synthetic) --------------------------------
PAD_IDX = 0   # BytePairEncoding.PAD_token_idx
SEP_IDX = 1   # BytePairEncoding.SEP_token_idx

# ---- small, forward-consistent hyper-parameters ----------------------------
TOKEN_NUM = 50
HIDDEN    = 32
N_HEAD    = 4
D_K       = HIDDEN // N_HEAD
FF_DIM    = 64
N_LAYERS  = 2
MAX_LEN   = 64
SEQ       = 8
BATCH     = 2

LN_EPS  = 1e-5          # plain Python floats only -> nothing captured as a
NEG_INF = -1e30         # traced constant inside the kernel.


# =============================================================================
# Fused model kernel: N_LAYERS encoder blocks + classifier head, one launch.
# =============================================================================
def _layer_norm(x, gamma, beta):
    mu  = jnp.mean(x, axis=-1, keepdims=True)
    var = jnp.mean(jnp.square(x - mu), axis=-1, keepdims=True)
    return (x - mu) * jax.lax.rsqrt(var + LN_EPS) * gamma + beta


def _model_kernel(x_ref, keep_ref, bias_ref,
                  wqkv_ref, wo_ref,
                  ln1g_ref, ln1b_ref,
                  w1_ref, b1_ref, w2_ref, b2_ref,
                  ln2g_ref, ln2b_ref,
                  cw1_ref, cb1_ref, cw2_ref, cb2_ref,
                  o_ref, *, n_layers, n_head, d_k):
    x    = x_ref[...]        # (B, S, H)  embedded tokens, PAD rows already zero
    keep = keep_ref[...]     # (B, S, 1)  1.0 for non-<PAD>, 0.0 for <PAD>
    bias = bias_ref[...]     # (B, 1, S)  additive key mask (NEG_INF at <PAD>)
    B, S, H = x.shape
    scale = 1.0 / math.sqrt(d_k)

    for l in range(n_layers):                       # static unrolled layer loop
        # --- fused Q/K/V projection: one (B*S,H) @ (H,3H) matmul -------------
        x2  = x.reshape(B * S, H)
        qkv = jnp.dot(x2, wqkv_ref[l], preferred_element_type=jnp.float32)
        qkv = qkv.reshape(B, S, 3 * H)

        # --- multi-head attention, batched over B, short static head loop ---
        heads = []
        for h in range(n_head):
            q = qkv[:, :,           h * d_k:          (h + 1) * d_k]
            k = qkv[:, :,     H +   h * d_k:    H +   (h + 1) * d_k]
            v = qkv[:, :, 2 * H +   h * d_k: 2 * H +  (h + 1) * d_k]
            s = jnp.einsum('bqd,bkd->bqk', q, k,
                           preferred_element_type=jnp.float32) * scale
            s = s + bias                                   # mask <PAD> keys
            m = jnp.max(s, axis=-1, keepdims=True)
            e = jnp.exp(s - m)
            p = e / jnp.sum(e, axis=-1, keepdims=True)     # softmax
            heads.append(jnp.einsum('bqk,bkd->bqd', p, v,
                                    preferred_element_type=jnp.float32))
        ctx = jnp.concatenate(heads, axis=-1) * keep       # zero <PAD> query rows
        att = jnp.dot(ctx.reshape(B * S, H), wo_ref[l],
                      preferred_element_type=jnp.float32).reshape(B, S, H)

        # --- residual + LayerNorm 1 (dropout = identity at inference) -------
        y = _layer_norm(att + x, ln1g_ref[l], ln1b_ref[l])

        # --- feed-forward + residual + LayerNorm 2 ---------------------------
        h1 = jnp.maximum(
            jnp.dot(y.reshape(B * S, H), w1_ref[l],
                    preferred_element_type=jnp.float32) + b1_ref[l], 0.0)
        f = (jnp.dot(h1, w2_ref[l],
                     preferred_element_type=jnp.float32) + b2_ref[l]).reshape(B, S, H)
        z = _layer_norm(f + y, ln2g_ref[l], ln2b_ref[l])

        x = z * keep                                       # output[padding_mask] = 0

    # --- classifier head: Linear(H,2H) -> ReLU -> Linear(2H,2) --------------
    cls_in = x[:, 0, :]                                    # == torch out[0, ...]
    hc = jnp.maximum(
        jnp.dot(cls_in, cw1_ref[...],
                preferred_element_type=jnp.float32) + cb1_ref[...], 0.0)
    o_ref[...] = jnp.dot(hc, cw2_ref[...],
                         preferred_element_type=jnp.float32) + cb2_ref[...]


def bert_classifier_kernel(x, keep, bias, enc, cls):
    """Single-launch fused forward: x (B,S,H) -> logits (B,2)."""
    B, S, H = x.shape
    kernel = functools.partial(_model_kernel,
                               n_layers=N_LAYERS, n_head=N_HEAD, d_k=D_K)
    return pl.pallas_call(
        kernel,
        out_shape=jax.ShapeDtypeStruct((B, 2), jnp.float32),
    )(x, keep, bias,
      enc['wqkv'], enc['wo'],
      enc['ln1g'], enc['ln1b'],
      enc['w1'], enc['b1'], enc['w2'], enc['b2'],
      enc['ln2g'], enc['ln2b'],
      cls['w1'], cls['b1'], cls['w2'], cls['b2'])


# =============================================================================
# Parameter initialization (deterministic, synthetic)
# =============================================================================
def init_params(key):
    keys = iter(jax.random.split(key, 16))

    def nrm(shape, scale=0.02):
        return scale * jax.random.normal(next(keys), shape, dtype=jnp.float32)

    emb = nrm((TOKEN_NUM, HIDDEN)).at[PAD_IDX].set(0.0)   # nn.Embedding padding_idx
    seg = nrm((3, HIDDEN))                                # SegmentationEmbeddings

    # PositionalEncoding buffer (sin/cos), exactly as in the PyTorch module
    pos = jnp.arange(MAX_LEN, dtype=jnp.float32)[:, None]
    div = jnp.exp(jnp.arange(0, HIDDEN, 2, dtype=jnp.float32)
                  * (-math.log(10000.0) / HIDDEN))
    pe = jnp.zeros((MAX_LEN, HIDDEN), jnp.float32)
    pe = pe.at[:, 0::2].set(jnp.sin(pos * div))
    pe = pe.at[:, 1::2].set(jnp.cos(pos * div))

    L, H, F = N_LAYERS, HIDDEN, FF_DIM
    enc = dict(
        wqkv=nrm((L, H, 3 * H)),                    # fused [Wq | Wk | Wv]
        wo=nrm((L, H, H)),
        ln1g=jnp.ones((L, 1, H), jnp.float32),
        ln1b=jnp.zeros((L, 1, H), jnp.float32),
        w1=nrm((L, H, F)), b1=nrm((L, 1, F)),
        w2=nrm((L, F, H)), b2=nrm((L, 1, H)),
        ln2g=jnp.ones((L, 1, H), jnp.float32),
        ln2b=jnp.zeros((L, 1, H), jnp.float32))

    cls = dict(w1=nrm((H, 2 * H)), b1=nrm((1, 2 * H)),
               w2=nrm((2 * H, 2)), b2=nrm((1, 2)))

    return dict(embedding=emb, seg_emb=seg, pe=pe, enc=enc, cls=cls)


# =============================================================================
# Full IMDBmodel forward pass
# =============================================================================
@jax.jit
def imdb_forward(tokens, params):
    B, S = tokens.shape
    pad = (tokens == PAD_IDX)                                    # (B, S) bool

    # --- plain-JAX glue: embedding gather + positional + segment embeddings --
    out = params['embedding'][tokens]                            # (B, S, H)
    out = out + params['pe'][None, :S, :]
    is_sep = (tokens == SEP_IDX).astype(jnp.int32)
    seg_ids = jnp.cumsum(is_sep, axis=1) - is_sep                # segmentation ids
    out = out + params['seg_emb'][seg_ids]
    # dropout layers are identity at inference time
    out = jnp.where(pad[..., None], 0.0, out)                    # out[padding_mask] = 0

    # --- padding masks, computed once -----------------------------------------
    keep = (~pad).astype(jnp.float32)[..., None]                 # (B, S, 1)
    bias = jnp.where(pad, NEG_INF, 0.0).astype(jnp.float32)[:, None, :]  # (B, 1, S)

    # --- fused encoder stack + classifier (single Pallas launch) --------------
    return bert_classifier_kernel(out, keep, bias, params['enc'], params['cls'])


# =============================================================================
if __name__ == "__main__":
    root = jax.random.PRNGKey(0)
    k_param, k_tok = jax.random.split(root)

    params = init_params(k_param)

    # deterministic synthetic token ids: regular tokens in [2, TOKEN_NUM),
    # one SEP per sequence, PAD padding at the tail.
    tokens = jax.random.randint(k_tok, (BATCH, SEQ), 2, TOKEN_NUM, dtype=jnp.int32)
    tokens = tokens.at[0, 3].set(SEP_IDX)
    tokens = tokens.at[1, 5].set(SEP_IDX)
    tokens = tokens.at[0, 6:].set(PAD_IDX)
    tokens = tokens.at[1, 7:].set(PAD_IDX)

    logits = imdb_forward(tokens, params)
    jax.block_until_ready(logits)
    assert logits.shape == (BATCH, 2) and logits.dtype == jnp.float32
    print("KERNEL_OK")
</pallas_src>

<mosaic_0001>
module attributes {stable_mosaic.version = 11 : i64} {
  func.func @_model_kernel(%arg0: memref<2x8x32xf32, #tpu.memory_space<vmem>>, %arg1: memref<2x8x1xf32, #tpu.memory_space<vmem>>, %arg2: memref<2x1x8xf32, #tpu.memory_space<vmem>>, %arg3: memref<2x32x96xf32, #tpu.memory_space<vmem>>, %arg4: memref<2x32x32xf32, #tpu.memory_space<vmem>>, %arg5: memref<2x1x32xf32, #tpu.memory_space<vmem>>, %arg6: memref<2x1x32xf32, #tpu.memory_space<vmem>>, %arg7: memref<2x32x64xf32, #tpu.memory_space<vmem>>, %arg8: memref<2x1x64xf32, #tpu.memory_space<vmem>>, %arg9: memref<2x64x32xf32, #tpu.memory_space<vmem>>, %arg10: memref<2x1x32xf32, #tpu.memory_space<vmem>>, %arg11: memref<2x1x32xf32, #tpu.memory_space<vmem>>, %arg12: memref<2x1x32xf32, #tpu.memory_space<vmem>>, %arg13: memref<32x64xf32, #tpu.memory_space<vmem>>, %arg14: memref<1x64xf32, #tpu.memory_space<vmem>>, %arg15: memref<64x2xf32, #tpu.memory_space<vmem>>, %arg16: memref<1x2xf32, #tpu.memory_space<vmem>>, %arg17: memref<2x2xf32, #tpu.memory_space<vmem>>) attributes {dimension_semantics = [], scalar_prefetch = 0 : i64, scratch_operands = 0 : i64, tpu.core_type = #tpu.core_type<tc>} {
    %c0 = arith.constant 0 : index
    %c0_0 = arith.constant 0 : index
    %c0_1 = arith.constant 0 : index
    %0 = vector.load %arg0[%c0, %c0_0, %c0_1] : memref<2x8x32xf32, #tpu.memory_space<vmem>>, vector<2x8x32xf32>
    %c0_2 = arith.constant 0 : index
    %c0_3 = arith.constant 0 : index
    %c0_4 = arith.constant 0 : index
    %1 = vector.load %arg1[%c0_2, %c0_3, %c0_4] : memref<2x8x1xf32, #tpu.memory_space<vmem>>, vector<2x8x1xf32>
    %c0_5 = arith.constant 0 : index
    %c0_6 = arith.constant 0 : index
    %c0_7 = arith.constant 0 : index
    %2 = vector.load %arg2[%c0_5, %c0_6, %c0_7] : memref<2x1x8xf32, #tpu.memory_space<vmem>>, vector<2x1x8xf32>
    %3 = vector.shape_cast %0 : vector<2x8x32xf32> to vector<16x32xf32>
    %c0_8 = arith.constant 0 : index
    %c0_9 = arith.constant 0 : index
    %c0_10 = arith.constant 0 : index
    %4 = vector.load %arg3[%c0_8, %c0_9, %c0_10] : memref<2x32x96xf32, #tpu.memory_space<vmem>>, vector<1x32x96xf32>
    %5 = vector.shape_cast %4 : vector<1x32x96xf32> to vector<32x96xf32>
    %cst = arith.constant dense<0.000000e+00> : vector<16x96xf32>
    %6 = tpu.matmul %3, %5, %cst {dimension_numbers = #tpu.dot_dimension_numbers<[1], [0], [0], [1], [0, 0, 1, 1], [], []>} : vector<16x32xf32>, vector<32x96xf32>, vector<16x96xf32> -> vector<16x96xf32>
    %7 = vector.shape_cast %6 : vector<16x96xf32> to vector<2x8x96xf32>
    %8 = vector.extract_strided_slice %7 {offsets = [0, 0, 0], sizes = [2, 8, 8], strides = [1, 1, 1]} : vector<2x8x96xf32> to vector<2x8x8xf32>
    %9 = vector.extract_strided_slice %7 {offsets = [0, 0, 32], sizes = [2, 8, 8], strides = [1, 1, 1]} : vector<2x8x96xf32> to vector<2x8x8xf32>
    %10 = vector.extract_strided_slice %7 {offsets = [0, 0, 64], sizes = [2, 8, 8], strides = [1, 1, 1]} : vector<2x8x96xf32> to vector<2x8x8xf32>
    "tpu.trace_start"() <{level = 10 : i32, message = "bqd,bkd->bqk"}> : () -> ()
    %cst_11 = arith.constant dense<0.000000e+00> : vector<2x8x8xf32>
    %11 = tpu.matmul %8, %9, %cst_11 {dimension_numbers = #tpu.dot_dimension_numbers<[2], [2], [1], [1], [0, 0, 0, 1, 1, 1], [0], [0]>} : vector<2x8x8xf32>, vector<2x8x8xf32>, vector<2x8x8xf32> -> vector<2x8x8xf32>
    "tpu.trace_stop"() : () -> ()
    %cst_12 = arith.constant 0.353553385 : f32
    %12 = vector.broadcast %cst_12 : f32 to vector<2x8x8xf32>
    %13 = arith.mulf %11, %12 : vector<2x8x8xf32>
    %14 = vector.broadcast %2 : vector<2x1x8xf32> to vector<2x8x8xf32>
    %15 = arith.addf %13, %14 : vector<2x8x8xf32>
    %cst_13 = arith.constant dense<0xFF800000> : vector<2x8xf32>
    %16 = vector.multi_reduction <maximumf>, %15, %cst_13 [2] : vector<2x8x8xf32> to vector<2x8xf32>
    %17 = vector.shape_cast %16 : vector<2x8xf32> to vector<2x8x1xf32>
    %18 = vector.broadcast %17 : vector<2x8x1xf32> to vector<2x8x8xf32>
    %19 = arith.subf %15, %18 : vector<2x8x8xf32>
    %20 = math.exp %19 : vector<2x8x8xf32>
    %cst_14 = arith.constant dense<0.000000e+00> : vector<2x8xf32>
    %21 = vector.multi_reduction <add>, %20, %cst_14 [2] : vector<2x8x8xf32> to vector<2x8xf32>
    %22 = vector.shape_cast %21 : vector<2x8xf32> to vector<2x8x1xf32>
    %23 = vector.broadcast %22 : vector<2x8x1xf32> to vector<2x8x8xf32>
    %24 = arith.divf %20, %23 : vector<2x8x8xf32>
    "tpu.trace_start"() <{level = 10 : i32, message = "bqk,bkd->bqd"}> : () -> ()
    %cst_15 = arith.constant dense<0.000000e+00> : vector<2x8x8xf32>
    %25 = tpu.matmul %24, %10, %cst_15 {dimension_numbers = #tpu.dot_dimension_numbers<[2], [1], [1], [2], [0, 0, 0, 1, 1, 2], [0], [0]>} : vector<2x8x8xf32>, vector<2x8x8xf32>, vector<2x8x8xf32> -> vector<2x8x8xf32>
    "tpu.trace_stop"() : () -> ()
    %26 = vector.extract_strided_slice %7 {offsets = [0, 0, 8], sizes = [2, 8, 8], strides = [1, 1, 1]} : vector<2x8x96xf32> to vector<2x8x8xf32>
    %27 = vector.extract_strided_slice %7 {offsets = [0, 0, 40], sizes = [2, 8, 8], strides = [1, 1, 1]} : vector<2x8x96xf32> to vector<2x8x8xf32>
    %28 = vector.extract_strided_slice %7 {offsets = [0, 0, 72], sizes = [2, 8, 8], strides = [1, 1, 1]} : vector<2x8x96xf32> to vector<2x8x8xf32>
    "tpu.trace_start"() <{level = 10 : i32, message = "bqd,bkd->bqk"}> : () -> ()
    %cst_16 = arith.constant dense<0.000000e+00> : vector<2x8x8xf32>
    %29 = tpu.matmul %26, %27, %cst_16 {dimension_numbers = #tpu.dot_dimension_numbers<[2], [2], [1], [1], [0, 0, 0, 1, 1, 1], [0], [0]>} : vector<2x8x8xf32>, vector<2x8x8xf32>, vector<2x8x8xf32> -> vector<2x8x8xf32>
    "tpu.trace_stop"() : () -> ()
    %cst_17 = arith.constant 0.353553385 : f32
    %30 = vector.broadcast %cst_17 : f32 to vector<2x8x8xf32>
    %31 = arith.mulf %29, %30 : vector<2x8x8xf32>
    %32 = vector.broadcast %2 : vector<2x1x8xf32> to vector<2x8x8xf32>
    %33 = arith.addf %31, %32 : vector<2x8x8xf32>
    %cst_18 = arith.constant dense<0xFF800000> : vector<2x8xf32>
    %34 = vector.multi_reduction <maximumf>, %33, %cst_18 [2] : vector<2x8x8xf32> to vector<2x8xf32>
    %35 = vector.shape_cast %34 : vector<2x8xf32> to vector<2x8x1xf32>
    %36 = vector.broadcast %35 : vector<2x8x1xf32> to vector<2x8x8xf32>
    %37 = arith.subf %33, %36 : vector<2x8x8xf32>
    %38 = math.exp %37 : vector<2x8x8xf32>
    %cst_19 = arith.constant dense<0.000000e+00> : vector<2x8xf32>
    %39 = vector.multi_reduction <add>, %38, %cst_19 [2] : vector<2x8x8xf32> to vector<2x8xf32>
    %40 = vector.shape_cast %39 : vector<2x8xf32> to vector<2x8x1xf32>
    %41 = vector.broadcast %40 : vector<2x8x1xf32> to vector<2x8x8xf32>
    %42 = arith.divf %38, %41 : vector<2x8x8xf32>
    "tpu.trace_start"() <{level = 10 : i32, message = "bqk,bkd->bqd"}> : () -> ()
    %cst_20 = arith.constant dense<0.000000e+00> : vector<2x8x8xf32>
    %43 = tpu.matmul %42, %28, %cst_20 {dimension_numbers = #tpu.dot_dimension_numbers<[2], [1], [1], [2], [0, 0, 0, 1, 1, 2], [0], [0]>} : vector<2x8x8xf32>, vector<2x8x8xf32>, vector<2x8x8xf32> -> vector<2x8x8xf32>
    "tpu.trace_stop"() : () -> ()
    %44 = vector.extract_strided_slice %7 {offsets = [0, 0, 16], sizes = [2, 8, 8], strides = [1, 1, 1]} : vector<2x8x96xf32> to vector<2x8x8xf32>
    %45 = vector.extract_strided_slice %7 {offsets = [0, 0, 48], sizes = [2, 8, 8], strides = [1, 1, 1]} : vector<2x8x96xf32> to vector<2x8x8xf32>
    %46 = vector.extract_strided_slice %7 {offsets = [0, 0, 80], sizes = [2, 8, 8], strides = [1, 1, 1]} : vector<2x8x96xf32> to vector<2x8x8xf32>
    "tpu.trace_start"() <{level = 10 : i32, message = "bqd,bkd->bqk"}> : () -> ()
    %cst_21 = arith.constant dense<0.000000e+00> : vector<2x8x8xf32>
    %47 = tpu.matmul %44, %45, %cst_21 {dimension_numbers = #tpu.dot_dimension_numbers<[2], [2], [1], [1], [0, 0, 0, 1, 1, 1], [0], [0]>} : vector<2x8x8xf32>, vector<2x8x8xf32>, vector<2x8x8xf32> -> vector<2x8x8xf32>
    "tpu.trace_stop"() : () -> ()
    %cst_22 = arith.constant 0.353553385 : f32
    %48 = vector.broadcast %cst_22 : f32 to vector<2x8x8xf32>
    %49 = arith.mulf %47, %48 : vector<2x8x8xf32>
    %50 = vector.broadcast %2 : vector<2x1x8xf32> to vector<2x8x8xf32>
    %51 = arith.addf %49, %50 : vector<2x8x8xf32>
    %cst_23 = arith.constant dense<0xFF800000> : vector<2x8xf32>
    %52 = vector.multi_reduction <maximumf>, %51, %cst_23 [2] : vector<2x8x8xf32> to vector<2x8xf32>
    %53 = vector.shape_cast %52 : vector<2x8xf32> to vector<2x8x1xf32>
    %54 = vector.broadcast %53 : vector<2x8x1xf32> to vector<2x8x8xf32>
    %55 = arith.subf %51, %54 : vector<2x8x8xf32>
    %56 = math.exp %55 : vector<2x8x8xf32>
    %cst_24 = arith.constant dense<0.000000e+00> : vector<2x8xf32>
    %57 = vector.multi_reduction <add>, %56, %cst_24 [2] : vector<2x8x8xf32> to vector<2x8xf32>
    %58 = vector.shape_cast %57 : vector<2x8xf32> to vector<2x8x1xf32>
    %59 = vector.broadcast %58 : vector<2x8x1xf32> to vector<2x8x8xf32>
    %60 = arith.divf %56, %59 : vector<2x8x8xf32>
    "tpu.trace_start"() <{level = 10 : i32, message = "bqk,bkd->bqd"}> : () -> ()
    %cst_25 = arith.constant dense<0.000000e+00> : vector<2x8x8xf32>
    %61 = tpu.matmul %60, %46, %cst_25 {dimension_numbers = #tpu.dot_dimension_numbers<[2], [1], [1], [2], [0, 0, 0, 1, 1, 2], [0], [0]>} : vector<2x8x8xf32>, vector<2x8x8xf32>, vector<2x8x8xf32> -> vector<2x8x8xf32>
    "tpu.trace_stop"() : () -> ()
    %62 = vector.extract_strided_slice %7 {offsets = [0, 0, 24], sizes = [2, 8, 8], strides = [1, 1, 1]} : vector<2x8x96xf32> to vector<2x8x8xf32>
    %63 = vector.extract_strided_slice %7 {offsets = [0, 0, 56], sizes = [2, 8, 8], strides = [1, 1, 1]} : vector<2x8x96xf32> to vector<2x8x8xf32>
    %64 = vector.extract_strided_slice %7 {offsets = [0, 0, 88], sizes = [2, 8, 8], strides = [1, 1, 1]} : vector<2x8x96xf32> to vector<2x8x8xf32>
    "tpu.trace_start"() <{level = 10 : i32, message = "bqd,bkd->bqk"}> : () -> ()
    %cst_26 = arith.constant dense<0.000000e+00> : vector<2x8x8xf32>
    %65 = tpu.matmul %62, %63, %cst_26 {dimension_numbers = #tpu.dot_dimension_numbers<[2], [2], [1], [1], [0, 0, 0, 1, 1, 1], [0], [0]>} : vector<2x8x8xf32>, vector<2x8x8xf32>, vector<2x8x8xf32> -> vector<2x8x8xf32>
    "tpu.trace_stop"() : () -> ()
    %cst_27 = arith.constant 0.353553385 : f32
    %66 = vector.broadcast %cst_27 : f32 to vector<2x8x8xf32>
    %67 = arith.mulf %65, %66 : vector<2x8x8xf32>
    %68 = vector.broadcast %2 : vector<2x1x8xf32> to vector<2x8x8xf32>
    %69 = arith.addf %67, %68 : vector<2x8x8xf32>
    %cst_28 = arith.constant dense<0xFF800000> : vector<2x8xf32>
    %70 = vector.multi_reduction <maximumf>, %69, %cst_28 [2] : vector<2x8x8xf32> to vector<2x8xf32>
    %71 = vector.shape_cast %70 : vector<2x8xf32> to vector<2x8x1xf32>
    %72 = vector.broadcast %71 : vector<2x8x1xf32> to vector<2x8x8xf32>
    %73 = arith.subf %69, %72 : vector<2x8x8xf32>
    %74 = math.exp %73 : vector<2x8x8xf32>
    %cst_29 = arith.constant dense<0.000000e+00> : vector<2x8xf32>
    %75 = vector.multi_reduction <add>, %74, %cst_29 [2] : vector<2x8x8xf32> to vector<2x8xf32>
    %76 = vector.shape_cast %75 : vector<2x8xf32> to vector<2x8x1xf32>
    %77 = vector.broadcast %76 : vector<2x8x1xf32> to vector<2x8x8xf32>
    %78 = arith.divf %74, %77 : vector<2x8x8xf32>
    "tpu.trace_start"() <{level = 10 : i32, message = "bqk,bkd->bqd"}> : () -> ()
    %cst_30 = arith.constant dense<0.000000e+00> : vector<2x8x8xf32>
    %79 = tpu.matmul %78, %64, %cst_30 {dimension_numbers = #tpu.dot_dimension_numbers<[2], [1], [1], [2], [0, 0, 0, 1, 1, 2], [0], [0]>} : vector<2x8x8xf32>, vector<2x8x8xf32>, vector<2x8x8xf32> -> vector<2x8x8xf32>
    "tpu.trace_stop"() : () -> ()
    %80 = tpu.concatenate %25, %43, %61, %79 in 2 : vector<2x8x8xf32>, vector<2x8x8xf32>, vector<2x8x8xf32>, vector<2x8x8xf32> -> vector<2x8x32xf32>
    %81 = vector.broadcast %1 : vector<2x8x1xf32> to vector<2x8x32xf32>
    %82 = arith.mulf %80, %81 : vector<2x8x32xf32>
    %83 = vector.shape_cast %82 : vector<2x8x32xf32> to vector<16x32xf32>
    %c0_31 = arith.constant 0 : index
    %c0_32 = arith.constant 0 : index
    %c0_33 = arith.constant 0 : index
    %84 = vector.load %arg4[%c0_31, %c0_32, %c0_33] : memref<2x32x32xf32, #tpu.memory_space<vmem>>, vector<1x32x32xf32>
    %85 = vector.shape_cast %84 : vector<1x32x32xf32> to vector<32x32xf32>
    %cst_34 = arith.constant dense<0.000000e+00> : vector<16x32xf32>
    %86 = tpu.matmul %83, %85, %cst_34 {dimension_numbers = #tpu.dot_dimension_numbers<[1], [0], [0], [1], [0, 0, 1, 1], [], []>} : vector<16x32xf32>, vector<32x32xf32>, vector<16x32xf32> -> vector<16x32xf32>
    %87 = vector.shape_cast %86 : vector<16x32xf32> to vector<2x8x32xf32>
    %88 = arith.addf %87, %0 : vector<2x8x32xf32>
    %c0_35 = arith.constant 0 : index
    %c0_36 = arith.constant 0 : index
    %c0_37 = arith.constant 0 : index
    %89 = vector.load %arg5[%c0_35, %c0_36, %c0_37] : memref<2x1x32xf32, #tpu.memory_space<vmem>>, vector<1x1x32xf32>
    %90 = vector.shape_cast %89 : vector<1x1x32xf32> to vector<1x32xf32>
    %c0_38 = arith.constant 0 : index
    %c0_39 = arith.constant 0 : index
    %c0_40 = arith.constant 0 : index
    %91 = vector.load %arg6[%c0_38, %c0_39, %c0_40] : memref<2x1x32xf32, #tpu.memory_space<vmem>>, vector<1x1x32xf32>
    %92 = vector.shape_cast %91 : vector<1x1x32xf32> to vector<1x32xf32>
    %cst_41 = arith.constant dense<0.000000e+00> : vector<2x8xf32>
    %93 = vector.multi_reduction <add>, %88, %cst_41 [2] : vector<2x8x32xf32> to vector<2x8xf32>
    %94 = vector.shape_cast %93 : vector<2x8xf32> to vector<2x8x1xf32>
    %cst_42 = arith.constant 3.200000e+01 : f32
    %95 = vector.broadcast %cst_42 : f32 to vector<2x8x1xf32>
    %96 = arith.divf %94, %95 : vector<2x8x1xf32>
    %97 = vector.broadcast %96 : vector<2x8x1xf32> to vector<2x8x32xf32>
    %98 = arith.subf %88, %97 : vector<2x8x32xf32>
    %99 = arith.mulf %98, %98 : vector<2x8x32xf32>
    %cst_43 = arith.constant dense<0.000000e+00> : vector<2x8xf32>
    %100 = vector.multi_reduction <add>, %99, %cst_43 [2] : vector<2x8x32xf32> to vector<2x8xf32>
    %101 = vector.shape_cast %100 : vector<2x8xf32> to vector<2x8x1xf32>
    %cst_44 = arith.constant 3.200000e+01 : f32
    %102 = vector.broadcast %cst_44 : f32 to vector<2x8x1xf32>
    %103 = arith.divf %101, %102 : vector<2x8x1xf32>
    %104 = vector.broadcast %96 : vector<2x8x1xf32> to vector<2x8x32xf32>
    %105 = arith.subf %88, %104 : vector<2x8x32xf32>
    %cst_45 = arith.constant 9.99999974E-6 : f32
    %106 = vector.broadcast %cst_45 : f32 to vector<2x8x1xf32>
    %107 = arith.addf %103, %106 : vector<2x8x1xf32>
    %108 = math.rsqrt %107 : vector<2x8x1xf32>
    %109 = vector.broadcast %108 : vector<2x8x1xf32> to vector<2x8x32xf32>
    %110 = arith.mulf %105, %109 : vector<2x8x32xf32>
    %111 = vector.shape_cast %90 : vector<1x32xf32> to vector<1x1x32xf32>
    %112 = vector.broadcast %111 : vector<1x1x32xf32> to vector<2x8x32xf32>
    %113 = arith.mulf %110, %112 : vector<2x8x32xf32>
    %114 = vector.shape_cast %92 : vector<1x32xf32> to vector<1x1x32xf32>
    %115 = vector.broadcast %114 : vector<1x1x32xf32> to vector<2x8x32xf32>
    %116 = arith.addf %113, %115 : vector<2x8x32xf32>
    %117 = vector.shape_cast %116 : vector<2x8x32xf32> to vector<16x32xf32>
    %c0_46 = arith.constant 0 : index
    %c0_47 = arith.constant 0 : index
    %c0_48 = arith.constant 0 : index
    %118 = vector.load %arg7[%c0_46, %c0_47, %c0_48] : memref<2x32x64xf32, #tpu.memory_space<vmem>>, vector<1x32x64xf32>
    %119 = vector.shape_cast %118 : vector<1x32x64xf32> to vector<32x64xf32>
    %cst_49 = arith.constant dense<0.000000e+00> : vector<16x64xf32>
    %120 = tpu.matmul %117, %119, %cst_49 {dimension_numbers = #tpu.dot_dimension_numbers<[1], [0], [0], [1], [0, 0, 1, 1], [], []>} : vector<16x32xf32>, vector<32x64xf32>, vector<16x64xf32> -> vector<16x64xf32>
    %c0_50 = arith.constant 0 : index
    %c0_51 = arith.constant 0 : index
    %c0_52 = arith.constant 0 : index
    %121 = vector.load %arg8[%c0_50, %c0_51, %c0_52] : memref<2x1x64xf32, #tpu.memory_space<vmem>>, vector<1x1x64xf32>
    %122 = vector.shape_cast %121 : vector<1x1x64xf32> to vector<1x64xf32>
    %123 = vector.broadcast %122 : vector<1x64xf32> to vector<16x64xf32>
    %124 = arith.addf %120, %123 : vector<16x64xf32>
    %cst_53 = arith.constant 0.000000e+00 : f32
    %125 = vector.broadcast %cst_53 : f32 to vector<16x64xf32>
    %126 = arith.maximumf %124, %125 : vector<16x64xf32>
    %c0_54 = arith.constant 0 : index
    %c0_55 = arith.constant 0 : index
    %c0_56 = arith.constant 0 : index
    %127 = vector.load %arg9[%c0_54, %c0_55, %c0_56] : memref<2x64x32xf32, #tpu.memory_space<vmem>>, vector<1x64x32xf32>
    %128 = vector.shape_cast %127 : vector<1x64x32xf32> to vector<64x32xf32>
    %cst_57 = arith.constant dense<0.000000e+00> : vector<16x32xf32>
    %129 = tpu.matmul %126, %128, %cst_57 {dimension_numbers = #tpu.dot_dimension_numbers<[1], [0], [0], [1], [0, 0, 1, 1], [], []>} : vector<16x64xf32>, vector<64x32xf32>, vector<16x32xf32> -> vector<16x32xf32>
    %c0_58 = arith.constant 0 : index
    %c0_59 = arith.constant 0 : index
    %c0_60 = arith.constant 0 : index
    %130 = vector.load %arg10[%c0_58, %c0_59, %c0_60] : memref<2x1x32xf32, #tpu.memory_space<vmem>>, vector<1x1x32xf32>
    %131 = vector.shape_cast %130 : vector<1x1x32xf32> to vector<1x32xf32>
    %132 = vector.broadcast %131 : vector<1x32xf32> to vector<16x32xf32>
    %133 = arith.addf %129, %132 : vector<16x32xf32>
    %134 = vector.shape_cast %133 : vector<16x32xf32> to vector<2x8x32xf32>
    %135 = arith.addf %134, %116 : vector<2x8x32xf32>
    %c0_61 = arith.constant 0 : index
    %c0_62 = arith.constant 0 : index
    %c0_63 = arith.constant 0 : index
    %136 = vector.load %arg11[%c0_61, %c0_62, %c0_63] : memref<2x1x32xf32, #tpu.memory_space<vmem>>, vector<1x1x32xf32>
    %137 = vector.shape_cast %136 : vector<1x1x32xf32> to vector<1x32xf32>
    %c0_64 = arith.constant 0 : index
    %c0_65 = arith.constant 0 : index
    %c0_66 = arith.constant 0 : index
    %138 = vector.load %arg12[%c0_64, %c0_65, %c0_66] : memref<2x1x32xf32, #tpu.memory_space<vmem>>, vector<1x1x32xf32>
    %139 = vector.shape_cast %138 : vector<1x1x32xf32> to vector<1x32xf32>
    %cst_67 = arith.constant dense<0.000000e+00> : vector<2x8xf32>
    %140 = vector.multi_reduction <add>, %135, %cst_67 [2] : vector<2x8x32xf32> to vector<2x8xf32>
    %141 = vector.shape_cast %140 : vector<2x8xf32> to vector<2x8x1xf32>
    %cst_68 = arith.constant 3.200000e+01 : f32
    %142 = vector.broadcast %cst_68 : f32 to vector<2x8x1xf32>
    %143 = arith.divf %141, %142 : vector<2x8x1xf32>
    %144 = vector.broadcast %143 : vector<2x8x1xf32> to vector<2x8x32xf32>
    %145 = arith.subf %135, %144 : vector<2x8x32xf32>
    %146 = arith.mulf %145, %145 : vector<2x8x32xf32>
    %cst_69 = arith.constant dense<0.000000e+00> : vector<2x8xf32>
    %147 = vector.multi_reduction <add>, %146, %cst_69 [2] : vector<2x8x32xf32> to vector<2x8xf32>
    %148 = vector.shape_cast %147 : vector<2x8xf32> to vector<2x8x1xf32>
    %cst_70 = arith.constant 3.200000e+01 : f32
    %149 = vector.broadcast %cst_70 : f32 to vector<2x8x1xf32>
    %150 = arith.divf %148, %149 : vector<2x8x1xf32>
    %151 = vector.broadcast %143 : vector<2x8x1xf32> to vector<2x8x32xf32>
    %152 = arith.subf %135, %151 : vector<2x8x32xf32>
    %cst_71 = arith.constant 9.99999974E-6 : f32
    %153 = vector.broadcast %cst_71 : f32 to vector<2x8x1xf32>
    %154 = arith.addf %150, %153 : vector<2x8x1xf32>
    %155 = math.rsqrt %154 : vector<2x8x1xf32>
    %156 = vector.broadcast %155 : vector<2x8x1xf32> to vector<2x8x32xf32>
    %157 = arith.mulf %152, %156 : vector<2x8x32xf32>
    %158 = vector.shape_cast %137 : vector<1x32xf32> to vector<1x1x32xf32>
    %159 = vector.broadcast %158 : vector<1x1x32xf32> to vector<2x8x32xf32>
    %160 = arith.mulf %157, %159 : vector<2x8x32xf32>
    %161 = vector.shape_cast %139 : vector<1x32xf32> to vector<1x1x32xf32>
    %162 = vector.broadcast %161 : vector<1x1x32xf32> to vector<2x8x32xf32>
    %163 = arith.addf %160, %162 : vector<2x8x32xf32>
    %164 = vector.broadcast %1 : vector<2x8x1xf32> to vector<2x8x32xf32>
    %165 = arith.mulf %163, %164 : vector<2x8x32xf32>
    %166 = vector.shape_cast %165 : vector<2x8x32xf32> to vector<16x32xf32>
    %c1 = arith.constant 1 : index
    %c0_72 = arith.constant 0 : index
    %c0_73 = arith.constant 0 : index
    %167 = vector.load %arg3[%c1, %c0_72, %c0_73] : memref<2x32x96xf32, #tpu.memory_space<vmem>>, vector<1x32x96xf32>
    %168 = vector.shape_cast %167 : vector<1x32x96xf32> to vector<32x96xf32>
    %cst_74 = arith.constant dense<0.000000e+00> : vector<16x96xf32>
    %169 = tpu.matmul %166, %168, %cst_74 {dimension_numbers = #tpu.dot_dimension_numbers<[1], [0], [0], [1], [0, 0, 1, 1], [], []>} : vector<16x32xf32>, vector<32x96xf32>, vector<16x96xf32> -> vector<16x96xf32>
    %170 = vector.shape_cast %169 : vector<16x96xf32> to vector<2x8x96xf32>
    %171 = vector.extract_strided_slice %170 {offsets = [0, 0, 0], sizes = [2, 8, 8], strides = [1, 1, 1]} : vector<2x8x96xf32> to vector<2x8x8xf32>
    %172 = vector.extract_strided_slice %170 {offsets = [0, 0, 32], sizes = [2, 8, 8], strides = [1, 1, 1]} : vector<2x8x96xf32> to vector<2x8x8xf32>
    %173 = vector.extract_strided_slice %170 {offsets = [0, 0, 64], sizes = [2, 8, 8], strides = [1, 1, 1]} : vector<2x8x96xf32> to vector<2x8x8xf32>
    "tpu.trace_start"() <{level = 10 : i32, message = "bqd,bkd->bqk"}> : () -> ()
    %cst_75 = arith.constant dense<0.000000e+00> : vector<2x8x8xf32>
    %174 = tpu.matmul %171, %172, %cst_75 {dimension_numbers = #tpu.dot_dimension_numbers<[2], [2], [1], [1], [0, 0, 0, 1, 1, 1], [0], [0]>} : vector<2x8x8xf32>, vector<2x8x8xf32>, vector<2x8x8xf32> -> vector<2x8x8xf32>
    "tpu.trace_stop"() : () -> ()
    %cst_76 = arith.constant 0.353553385 : f32
    %175 = vector.broadcast %cst_76 : f32 to vector<2x8x8xf32>
    %176 = arith.mulf %174, %175 : vector<2x8x8xf32>
    %177 = vector.broadcast %2 : vector<2x1x8xf32> to vector<2x8x8xf32>
    %178 = arith.addf %176, %177 : vector<2x8x8xf32>
    %cst_77 = arith.constant dense<0xFF800000> : vector<2x8xf32>
    %179 = vector.multi_reduction <maximumf>, %178, %cst_77 [2] : vector<2x8x8xf32> to vector<2x8xf32>
    %180 = vector.shape_cast %179 : vector<2x8xf32> to vector<2x8x1xf32>
    %181 = vector.broadcast %180 : vector<2x8x1xf32> to vector<2x8x8xf32>
    %182 = arith.subf %178, %181 : vector<2x8x8xf32>
    %183 = math.exp %182 : vector<2x8x8xf32>
    %cst_78 = arith.constant dense<0.000000e+00> : vector<2x8xf32>
    %184 = vector.multi_reduction <add>, %183, %cst_78 [2] : vector<2x8x8xf32> to vector<2x8xf32>
    %185 = vector.shape_cast %184 : vector<2x8xf32> to vector<2x8x1xf32>
    %186 = vector.broadcast %185 : vector<2x8x1xf32> to vector<2x8x8xf32>
    %187 = arith.divf %183, %186 : vector<2x8x8xf32>
    "tpu.trace_start"() <{level = 10 : i32, message = "bqk,bkd->bqd"}> : () -> ()
    %cst_79 = arith.constant dense<0.000000e+00> : vector<2x8x8xf32>
    %188 = tpu.matmul %187, %173, %cst_79 {dimension_numbers = #tpu.dot_dimension_numbers<[2], [1], [1], [2], [0, 0, 0, 1, 1, 2], [0], [0]>} : vector<2x8x8xf32>, vector<2x8x8xf32>, vector<2x8x8xf32> -> vector<2x8x8xf32>
    "tpu.trace_stop"() : () -> ()
    %189 = vector.extract_strided_slice %170 {offsets = [0, 0, 8], sizes = [2, 8, 8], strides = [1, 1, 1]} : vector<2x8x96xf32> to vector<2x8x8xf32>
    %190 = vector.extract_strided_slice %170 {offsets = [0, 0, 40], sizes = [2, 8, 8], strides = [1, 1, 1]} : vector<2x8x96xf32> to vector<2x8x8xf32>
    %191 = vector.extract_strided_slice %170 {offsets = [0, 0, 72], sizes = [2, 8, 8], strides = [1, 1, 1]} : vector<2x8x96xf32> to vector<2x8x8xf32>
    "tpu.trace_start"() <{level = 10 : i32, message = "bqd,bkd->bqk"}> : () -> ()
    %cst_80 = arith.constant dense<0.000000e+00> : vector<2x8x8xf32>
    %192 = tpu.matmul %189, %190, %cst_80 {dimension_numbers = #tpu.dot_dimension_numbers<[2], [2], [1], [1], [0, 0, 0, 1, 1, 1], [0], [0]>} : vector<2x8x8xf32>, vector<2x8x8xf32>, vector<2x8x8xf32> -> vector<2x8x8xf32>
    "tpu.trace_stop"() : () -> ()
    %cst_81 = arith.constant 0.353553385 : f32
    %193 = vector.broadcast %cst_81 : f32 to vector<2x8x8xf32>
    %194 = arith.mulf %192, %193 : vector<2x8x8xf32>
    %195 = vector.broadcast %2 : vector<2x1x8xf32> to vector<2x8x8xf32>
    %196 = arith.addf %194, %195 : vector<2x8x8xf32>
    %cst_82 = arith.constant dense<0xFF800000> : vector<2x8xf32>
    %197 = vector.multi_reduction <maximumf>, %196, %cst_82 [2] : vector<2x8x8xf32> to vector<2x8xf32>
    %198 = vector.shape_cast %197 : vector<2x8xf32> to vector<2x8x1xf32>
    %199 = vector.broadcast %198 : vector<2x8x1xf32> to vector<2x8x8xf32>
    %200 = arith.subf %196, %199 : vector<2x8x8xf32>
    %201 = math.exp %200 : vector<2x8x8xf32>
    %cst_83 = arith.constant dense<0.000000e+00> : vector<2x8xf32>
    %202 = vector.multi_reduction <add>, %201, %cst_83 [2] : vector<2x8x8xf32> to vector<2x8xf32>
    %203 = vector.shape_cast %202 : vector<2x8xf32> to vector<2x8x1xf32>
    %204 = vector.broadcast %203 : vector<2x8x1xf32> to vector<2x8x8xf32>
    %205 = arith.divf %201, %204 : vector<2x8x8xf32>
    "tpu.trace_start"() <{level = 10 : i32, message = "bqk,bkd->bqd"}> : () -> ()
    %cst_84 = arith.constant dense<0.000000e+00> : vector<2x8x8xf32>
    %206 = tpu.matmul %205, %191, %cst_84 {dimension_numbers = #tpu.dot_dimension_numbers<[2], [1], [1], [2], [0, 0, 0, 1, 1, 2], [0], [0]>} : vector<2x8x8xf32>, vector<2x8x8xf32>, vector<2x8x8xf32> -> vector<2x8x8xf32>
    "tpu.trace_stop"() : () -> ()
    %207 = vector.extract_strided_slice %170 {offsets = [0, 0, 16], sizes = [2, 8, 8], strides = [1, 1, 1]} : vector<2x8x96xf32> to vector<2x8x8xf32>
    %208 = vector.extract_strided_slice %170 {offsets = [0, 0, 48], sizes = [2, 8, 8], strides = [1, 1, 1]} : vector<2x8x96xf32> to vector<2x8x8xf32>
    %209 = vector.extract_strided_slice %170 {offsets = [0, 0, 80], sizes = [2, 8, 8], strides = [1, 1, 1]} : vector<2x8x96xf32> to vector<2x8x8xf32>
    "tpu.trace_start"() <{level = 10 : i32, message = "bqd,bkd->bqk"}> : () -> ()
    %cst_85 = arith.constant dense<0.000000e+00> : vector<2x8x8xf32>
    %210 = tpu.matmul %207, %208, %cst_85 {dimension_numbers = #tpu.dot_dimension_numbers<[2], [2], [1], [1], [0, 0, 0, 1, 1, 1], [0], [0]>} : vector<2x8x8xf32>, vector<2x8x8xf32>, vector<2x8x8xf32> -> vector<2x8x8xf32>
    "tpu.trace_stop"() : () -> ()
    %cst_86 = arith.constant 0.353553385 : f32
    %211 = vector.broadcast %cst_86 : f32 to vector<2x8x8xf32>
    %212 = arith.mulf %210, %211 : vector<2x8x8xf32>
    %213 = vector.broadcast %2 : vector<2x1x8xf32> to vector<2x8x8xf32>
    %214 = arith.addf %212, %213 : vector<2x8x8xf32>
    %cst_87 = arith.constant dense<0xFF800000> : vector<2x8xf32>
    %215 = vector.multi_reduction <maximumf>, %214, %cst_87 [2] : vector<2x8x8xf32> to vector<2x8xf32>
    %216 = vector.shape_cast %215 : vector<2x8xf32> to vector<2x8x1xf32>
    %217 = vector.broadcast %216 : vector<2x8x1xf32> to vector<2x8x8xf32>
    %218 = arith.subf %214, %217 : vector<2x8x8xf32>
    %219 = math.exp %218 : vector<2x8x8xf32>
    %cst_88 = arith.constant dense<0.000000e+00> : vector<2x8xf32>
    %220 = vector.multi_reduction <add>, %219, %cst_88 [2] : vector<2x8x8xf32> to vector<2x8xf32>
    %221 = vector.shape_cast %220 : vector<2x8xf32> to vector<2x8x1xf32>
    %222 = vector.broadcast %221 : vector<2x8x1xf32> to vector<2x8x8xf32>
    %223 = arith.divf %219, %222 : vector<2x8x8xf32>
    "tpu.trace_start"() <{level = 10 : i32, message = "bqk,bkd->bqd"}> : () -> ()
    %cst_89 = arith.constant dense<0.000000e+00> : vector<2x8x8xf32>
    %224 = tpu.matmul %223, %209, %cst_89 {dimension_numbers = #tpu.dot_dimension_numbers<[2], [1], [1], [2], [0, 0, 0, 1, 1, 2], [0], [0]>} : vector<2x8x8xf32>, vector<2x8x8xf32>, vector<2x8x8xf32> -> vector<2x8x8xf32>
    "tpu.trace_stop"() : () -> ()
    %225 = vector.extract_strided_slice %170 {offsets = [0, 0, 24], sizes = [2, 8, 8], strides = [1, 1, 1]} : vector<2x8x96xf32> to vector<2x8x8xf32>
    %226 = vector.extract_strided_slice %170 {offsets = [0, 0, 56], sizes = [2, 8, 8], strides = [1, 1, 1]} : vector<2x8x96xf32> to vector<2x8x8xf32>
    %227 = vector.extract_strided_slice %170 {offsets = [0, 0, 88], sizes = [2, 8, 8], strides = [1, 1, 1]} : vector<2x8x96xf32> to vector<2x8x8xf32>
    "tpu.trace_start"() <{level = 10 : i32, message = "bqd,bkd->bqk"}> : () -> ()
    %cst_90 = arith.constant dense<0.000000e+00> : vector<2x8x8xf32>
    %228 = tpu.matmul %225, %226, %cst_90 {dimension_numbers = #tpu.dot_dimension_numbers<[2], [2], [1], [1], [0, 0, 0, 1, 1, 1], [0], [0]>} : vector<2x8x8xf32>, vector<2x8x8xf32>, vector<2x8x8xf32> -> vector<2x8x8xf32>
    "tpu.trace_stop"() : () -> ()
    %cst_91 = arith.constant 0.353553385 : f32
    %229 = vector.broadcast %cst_91 : f32 to vector<2x8x8xf32>
    %230 = arith.mulf %228, %229 : vector<2x8x8xf32>
    %231 = vector.broadcast %2 : vector<2x1x8xf32> to vector<2x8x8xf32>
    %232 = arith.addf %230, %231 : vector<2x8x8xf32>
    %cst_92 = arith.constant dense<0xFF800000> : vector<2x8xf32>
    %233 = vector.multi_reduction <maximumf>, %232, %cst_92 [2] : vector<2x8x8xf32> to vector<2x8xf32>
    %234 = vector.shape_cast %233 : vector<2x8xf32> to vector<2x8x1xf32>
    %235 = vector.broadcast %234 : vector<2x8x1xf32> to vector<2x8x8xf32>
    %236 = arith.subf %232, %235 : vector<2x8x8xf32>
    %237 = math.exp %236 : vector<2x8x8xf32>
    %cst_93 = arith.constant dense<0.000000e+00> : vector<2x8xf32>
    %238 = vector.multi_reduction <add>, %237, %cst_93 [2] : vector<2x8x8xf32> to vector<2x8xf32>
    %239 = vector.shape_cast %238 : vector<2x8xf32> to vector<2x8x1xf32>
    %240 = vector.broadcast %239 : vector<2x8x1xf32> to vector<2x8x8xf32>
    %241 = arith.divf %237, %240 : vector<2x8x8xf32>
    "tpu.trace_start"() <{level = 10 : i32, message = "bqk,bkd->bqd"}> : () -> ()
    %cst_94 = arith.constant dense<0.000000e+00> : vector<2x8x8xf32>
    %242 = tpu.matmul %241, %227, %cst_94 {dimension_numbers = #tpu.dot_dimension_numbers<[2], [1], [1], [2], [0, 0, 0, 1, 1, 2], [0], [0]>} : vector<2x8x8xf32>, vector<2x8x8xf32>, vector<2x8x8xf32> -> vector<2x8x8xf32>
    "tpu.trace_stop"() : () -> ()
    %243 = tpu.concatenate %188, %206, %224, %242 in 2 : vector<2x8x8xf32>, vector<2x8x8xf32>, vector<2x8x8xf32>, vector<2x8x8xf32> -> vector<2x8x32xf32>
    %244 = vector.broadcast %1 : vector<2x8x1xf32> to vector<2x8x32xf32>
    %245 = arith.mulf %243, %244 : vector<2x8x32xf32>
    %246 = vector.shape_cast %245 : vector<2x8x32xf32> to vector<16x32xf32>
    %c1_95 = arith.constant 1 : index
    %c0_96 = arith.constant 0 : index
    %c0_97 = arith.constant 0 : index
    %247 = vector.load %arg4[%c1_95, %c0_96, %c0_97] : memref<2x32x32xf32, #tpu.memory_space<vmem>>, vector<1x32x32xf32>
    %248 = vector.shape_cast %247 : vector<1x32x32xf32> to vector<32x32xf32>
    %cst_98 = arith.constant dense<0.000000e+00> : vector<16x32xf32>
    %249 = tpu.matmul %246, %248, %cst_98 {dimension_numbers = #tpu.dot_dimension_numbers<[1], [0], [0], [1], [0, 0, 1, 1], [], []>} : vector<16x32xf32>, vector<32x32xf32>, vector<16x32xf32> -> vector<16x32xf32>
    %250 = vector.shape_cast %249 : vector<16x32xf32> to vector<2x8x32xf32>
    %251 = arith.addf %250, %165 : vector<2x8x32xf32>
    %c1_99 = arith.constant 1 : index
    %c0_100 = arith.constant 0 : index
    %c0_101 = arith.constant 0 : index
    %252 = vector.load %arg5[%c1_99, %c0_100, %c0_101] : memref<2x1x32xf32, #tpu.memory_space<vmem>>, vector<1x1x32xf32>
    %253 = vector.shape_cast %252 : vector<1x1x32xf32> to vector<1x32xf32>
    %c1_102 = arith.constant 1 : index
    %c0_103 = arith.constant 0 : index
    %c0_104 = arith.constant 0 : index
    %254 = vector.load %arg6[%c1_102, %c0_103, %c0_104] : memref<2x1x32xf32, #tpu.memory_space<vmem>>, vector<1x1x32xf32>
    %255 = vector.shape_cast %254 : vector<1x1x32xf32> to vector<1x32xf32>
    %cst_105 = arith.constant dense<0.000000e+00> : vector<2x8xf32>
    %256 = vector.multi_reduction <add>, %251, %cst_105 [2] : vector<2x8x32xf32> to vector<2x8xf32>
    %257 = vector.shape_cast %256 : vector<2x8xf32> to vector<2x8x1xf32>
    %cst_106 = arith.constant 3.200000e+01 : f32
    %258 = vector.broadcast %cst_106 : f32 to vector<2x8x1xf32>
    %259 = arith.divf %257, %258 : vector<2x8x1xf32>
    %260 = vector.broadcast %259 : vector<2x8x1xf32> to vector<2x8x32xf32>
    %261 = arith.subf %251, %260 : vector<2x8x32xf32>
    %262 = arith.mulf %261, %261 : vector<2x8x32xf32>
    %cst_107 = arith.constant dense<0.000000e+00> : vector<2x8xf32>
    %263 = vector.multi_reduction <add>, %262, %cst_107 [2] : vector<2x8x32xf32> to vector<2x8xf32>
    %264 = vector.shape_cast %263 : vector<2x8xf32> to vector<2x8x1xf32>
    %cst_108 = arith.constant 3.200000e+01 : f32
    %265 = vector.broadcast %cst_108 : f32 to vector<2x8x1xf32>
    %266 = arith.divf %264, %265 : vector<2x8x1xf32>
    %267 = vector.broadcast %259 : vector<2x8x1xf32> to vector<2x8x32xf32>
    %268 = arith.subf %251, %267 : vector<2x8x32xf32>
    %cst_109 = arith.constant 9.99999974E-6 : f32
    %269 = vector.broadcast %cst_109 : f32 to vector<2x8x1xf32>
    %270 = arith.addf %266, %269 : vector<2x8x1xf32>
    %271 = math.rsqrt %270 : vector<2x8x1xf32>
    %272 = vector.broadcast %271 : vector<2x8x1xf32> to vector<2x8x32xf32>
    %273 = arith.mulf %268, %272 : vector<2x8x32xf32>
    %274 = vector.shape_cast %253 : vector<1x32xf32> to vector<1x1x32xf32>
    %275 = vector.broadcast %274 : vector<1x1x32xf32> to vector<2x8x32xf32>
    %276 = arith.mulf %273, %275 : vector<2x8x32xf32>
    %277 = vector.shape_cast %255 : vector<1x32xf32> to vector<1x1x32xf32>
    %278 = vector.broadcast %277 : vector<1x1x32xf32> to vector<2x8x32xf32>
    %279 = arith.addf %276, %278 : vector<2x8x32xf32>
    %280 = vector.shape_cast %279 : vector<2x8x32xf32> to vector<16x32xf32>
    %c1_110 = arith.constant 1 : index
    %c0_111 = arith.constant 0 : index
    %c0_112 = arith.constant 0 : index
    %281 = vector.load %arg7[%c1_110, %c0_111, %c0_112] : memref<2x32x64xf32, #tpu.memory_space<vmem>>, vector<1x32x64xf32>
    %282 = vector.shape_cast %281 : vector<1x32x64xf32> to vector<32x64xf32>
    %cst_113 = arith.constant dense<0.000000e+00> : vector<16x64xf32>
    %283 = tpu.matmul %280, %282, %cst_113 {dimension_numbers = #tpu.dot_dimension_numbers<[1], [0], [0], [1], [0, 0, 1, 1], [], []>} : vector<16x32xf32>, vector<32x64xf32>, vector<16x64xf32> -> vector<16x64xf32>
    %c1_114 = arith.constant 1 : index
    %c0_115 = arith.constant 0 : index
    %c0_116 = arith.constant 0 : index
    %284 = vector.load %arg8[%c1_114, %c0_115, %c0_116] : memref<2x1x64xf32, #tpu.memory_space<vmem>>, vector<1x1x64xf32>
    %285 = vector.shape_cast %284 : vector<1x1x64xf32> to vector<1x64xf32>
    %286 = vector.broadcast %285 : vector<1x64xf32> to vector<16x64xf32>
    %287 = arith.addf %283, %286 : vector<16x64xf32>
    %cst_117 = arith.constant 0.000000e+00 : f32
    %288 = vector.broadcast %cst_117 : f32 to vector<16x64xf32>
    %289 = arith.maximumf %287, %288 : vector<16x64xf32>
    %c1_118 = arith.constant 1 : index
    %c0_119 = arith.constant 0 : index
    %c0_120 = arith.constant 0 : index
    %290 = vector.load %arg9[%c1_118, %c0_119, %c0_120] : memref<2x64x32xf32, #tpu.memory_space<vmem>>, vector<1x64x32xf32>
    %291 = vector.shape_cast %290 : vector<1x64x32xf32> to vector<64x32xf32>
    %cst_121 = arith.constant dense<0.000000e+00> : vector<16x32xf32>
    %292 = tpu.matmul %289, %291, %cst_121 {dimension_numbers = #tpu.dot_dimension_numbers<[1], [0], [0], [1], [0, 0, 1, 1], [], []>} : vector<16x64xf32>, vector<64x32xf32>, vector<16x32xf32> -> vector<16x32xf32>
    %c1_122 = arith.constant 1 : index
    %c0_123 = arith.constant 0 : index
    %c0_124 = arith.constant 0 : index
    %293 = vector.load %arg10[%c1_122, %c0_123, %c0_124] : memref<2x1x32xf32, #tpu.memory_space<vmem>>, vector<1x1x32xf32>
    %294 = vector.shape_cast %293 : vector<1x1x32xf32> to vector<1x32xf32>
    %295 = vector.broadcast %294 : vector<1x32xf32> to vector<16x32xf32>
    %296 = arith.addf %292, %295 : vector<16x32xf32>
    %297 = vector.shape_cast %296 : vector<16x32xf32> to vector<2x8x32xf32>
    %298 = arith.addf %297, %279 : vector<2x8x32xf32>
    %c1_125 = arith.constant 1 : index
    %c0_126 = arith.constant 0 : index
    %c0_127 = arith.constant 0 : index
    %299 = vector.load %arg11[%c1_125, %c0_126, %c0_127] : memref<2x1x32xf32, #tpu.memory_space<vmem>>, vector<1x1x32xf32>
    %300 = vector.shape_cast %299 : vector<1x1x32xf32> to vector<1x32xf32>
    %c1_128 = arith.constant 1 : index
    %c0_129 = arith.constant 0 : index
    %c0_130 = arith.constant 0 : index
    %301 = vector.load %arg12[%c1_128, %c0_129, %c0_130] : memref<2x1x32xf32, #tpu.memory_space<vmem>>, vector<1x1x32xf32>
    %302 = vector.shape_cast %301 : vector<1x1x32xf32> to vector<1x32xf32>
    %cst_131 = arith.constant dense<0.000000e+00> : vector<2x8xf32>
    %303 = vector.multi_reduction <add>, %298, %cst_131 [2] : vector<2x8x32xf32> to vector<2x8xf32>
    %304 = vector.shape_cast %303 : vector<2x8xf32> to vector<2x8x1xf32>
    %cst_132 = arith.constant 3.200000e+01 : f32
    %305 = vector.broadcast %cst_132 : f32 to vector<2x8x1xf32>
    %306 = arith.divf %304, %305 : vector<2x8x1xf32>
    %307 = vector.broadcast %306 : vector<2x8x1xf32> to vector<2x8x32xf32>
    %308 = arith.subf %298, %307 : vector<2x8x32xf32>
    %309 = arith.mulf %308, %308 : vector<2x8x32xf32>
    %cst_133 = arith.constant dense<0.000000e+00> : vector<2x8xf32>
    %310 = vector.multi_reduction <add>, %309, %cst_133 [2] : vector<2x8x32xf32> to vector<2x8xf32>
    %311 = vector.shape_cast %310 : vector<2x8xf32> to vector<2x8x1xf32>
    %cst_134 = arith.constant 3.200000e+01 : f32
    %312 = vector.broadcast %cst_134 : f32 to vector<2x8x1xf32>
    %313 = arith.divf %311, %312 : vector<2x8x1xf32>
    %314 = vector.broadcast %306 : vector<2x8x1xf32> to vector<2x8x32xf32>
    %315 = arith.subf %298, %314 : vector<2x8x32xf32>
    %cst_135 = arith.constant 9.99999974E-6 : f32
    %316 = vector.broadcast %cst_135 : f32 to vector<2x8x1xf32>
    %317 = arith.addf %313, %316 : vector<2x8x1xf32>
    %318 = math.rsqrt %317 : vector<2x8x1xf32>
    %319 = vector.broadcast %318 : vector<2x8x1xf32> to vector<2x8x32xf32>
    %320 = arith.mulf %315, %319 : vector<2x8x32xf32>
    %321 = vector.shape_cast %300 : vector<1x32xf32> to vector<1x1x32xf32>
    %322 = vector.broadcast %321 : vector<1x1x32xf32> to vector<2x8x32xf32>
    %323 = arith.mulf %320, %322 : vector<2x8x32xf32>
    %324 = vector.shape_cast %302 : vector<1x32xf32> to vector<1x1x32xf32>
    %325 = vector.broadcast %324 : vector<1x1x32xf32> to vector<2x8x32xf32>
    %326 = arith.addf %323, %325 : vector<2x8x32xf32>
    %327 = vector.broadcast %1 : vector<2x8x1xf32> to vector<2x8x32xf32>
    %328 = arith.mulf %326, %327 : vector<2x8x32xf32>
    %329 = vector.extract_strided_slice %328 {offsets = [0, 0, 0], sizes = [2, 1, 32], strides = [1, 1, 1]} : vector<2x8x32xf32> to vector<2x1x32xf32>
    %330 = vector.shape_cast %329 : vector<2x1x32xf32> to vector<2x32xf32>
    %c0_136 = arith.constant 0 : index
    %c0_137 = arith.constant 0 : index
    %331 = vector.load %arg13[%c0_136, %c0_137] : memref<32x64xf32, #tpu.memory_space<vmem>>, vector<32x64xf32>
    %cst_138 = arith.constant dense<0.000000e+00> : vector<2x64xf32>
    %332 = tpu.matmul %330, %331, %cst_138 {dimension_numbers = #tpu.dot_dimension_numbers<[1], [0], [0], [1], [0, 0, 1, 1], [], []>} : vector<2x32xf32>, vector<32x64xf32>, vector<2x64xf32> -> vector<2x64xf32>
    %c0_139 = arith.constant 0 : index
    %c0_140 = arith.constant 0 : index
    %333 = vector.load %arg14[%c0_139, %c0_140] : memref<1x64xf32, #tpu.memory_space<vmem>>, vector<1x64xf32>
    %334 = vector.broadcast %333 : vector<1x64xf32> to vector<2x64xf32>
    %335 = arith.addf %332, %334 : vector<2x64xf32>
    %cst_141 = arith.constant 0.000000e+00 : f32
    %336 = vector.broadcast %cst_141 : f32 to vector<2x64xf32>
    %337 = arith.maximumf %335, %336 : vector<2x64xf32>
    %c0_142 = arith.constant 0 : index
    %c0_143 = arith.constant 0 : index
    %338 = vector.load %arg15[%c0_142, %c0_143] : memref<64x2xf32, #tpu.memory_space<vmem>>, vector<64x2xf32>
    %cst_144 = arith.constant dense<0.000000e+00> : vector<2x2xf32>
    %339 = tpu.matmul %337, %338, %cst_144 {dimension_numbers = #tpu.dot_dimension_numbers<[1], [0], [0], [1], [0, 0, 1, 1], [], []>} : vector<2x64xf32>, vector<64x2xf32>, vector<2x2xf32> -> vector<2x2xf32>
    %c0_145 = arith.constant 0 : index
    %c0_146 = arith.constant 0 : index
    %340 = vector.load %arg16[%c0_145, %c0_146] : memref<1x2xf32, #tpu.memory_space<vmem>>, vector<1x2xf32>
    %341 = vector.broadcast %340 : vector<1x2xf32> to vector<2x2xf32>
    %342 = arith.addf %339, %341 : vector<2x2xf32>
    %c0_147 = arith.constant 0 : index
    %c0_148 = arith.constant 0 : index
    %343 = vector.load %arg17[%c0_147, %c0_148] : memref<2x2xf32, #tpu.memory_space<vmem>>, vector<2x2xf32>
    tpu.vector_store %arg17[%c0_147, %c0_148], %342 {strides = array<i32>} : memref<2x2xf32, #tpu.memory_space<vmem>>, vector<2x2xf32>,
    return
  }
}

</mosaic_0001>

<bundles_post_ra>
// kernel: imdb_forward.1
= control target key start
LH: loop header
LB: loop body
LE: loop exit
PB: predicated region body
PF: predicated region fallthrough
CT: control target
= control target key end

     0   :  { %s5452_s0 = inlined_call_operand.vmem [shape: f32[2,8,32], index: 0, kind: input, shape index: {}]   ;;  %s5453_s1 = inlined_call_operand.vmem [shape: f32[2,8,1], index: 1, kind: input, shape index: {}]   ;;  %s5454_s2 = inlined_call_operand.vmem [shape: f32[2,1,8], index: 2, kind: input, shape index: {}]   ;;  %s5455_s3 = inlined_call_operand.vmem [shape: f32[2,32,96], index: 3, kind: input, shape index: {}]   ;;  %s5456_s4 = inlined_call_operand.vmem [shape: f32[2,32,32], index: 4, kind: input, shape index: {}]   ;;  %s5457_s5 = inlined_call_operand.vmem [shape: f32[2,1,32], index: 5, kind: input, shape index: {}]   ;;  %s5458_s6 = inlined_call_operand.vmem [shape: f32[2,1,32], index: 6, kind: input, shape index: {}]   ;;  %s5459_s7 = inlined_call_operand.vmem [shape: f32[2,32,64], index: 7, kind: input, shape index: {}]   ;;  %s5460_s8 = inlined_call_operand.vmem [shape: f32[2,1,64], index: 8, kind: input, shape index: {}]   ;;  %s5461_s9 = inlined_call_operand.vmem [shape: f32[2,64,32], index: 9, kind: input, shape index: {}]   ;;  %s5462_s10 = inlined_call_operand.vmem [shape: f32[2,1,32], index: 10, kind: input, shape index: {}]   ;;  %s5463_s11 = inlined_call_operand.vmem [shape: f32[2,1,32], index: 11, kind: input, shape index: {}]   ;;  %s5464_s12 = inlined_call_operand.vmem [shape: f32[2,1,32], index: 12, kind: input, shape index: {}]   ;;  %s5465_s13 = inlined_call_operand.vmem [shape: f32[32,64], index: 13, kind: input, shape index: {}]   ;;  %s5466_s14 = inlined_call_operand.vmem [shape: f32[1,64], index: 14, kind: input, shape index: {}]   ;;  %s5467_s15 = inlined_call_operand.vmem [shape: f32[64,2], index: 15, kind: input, shape index: {}]   ;;  %s5468_s16 = inlined_call_operand.vmem [shape: f32[1,2], index: 16, kind: input, shape index: {}]   ;;  %s5469_s17 = inlined_call_operand.hbm [shape: f32[2,2], index: 17, kind: output, shape index: {}]  }
   0x1   :  { %5490 = sst [smem:[#allocation5_spill]] %s5452_s0 }
   0x2   :  { %5491 = sst [smem:[#allocation6_spill]] %s5453_s1 }
   0x3   :  { %v63_v0 = vld [vmem:[%s5455_s3] sm:$0xff]  ;;  %v64_v1 = vld [vmem:[%s5455_s3 + $0x8] sm:$0xff]  ;;  %v65_v2 = vld [vmem:[%s5455_s3 + $0x10] sm:$0xff]  ;;  %vm67_vm0 = vcmask 261120   ;;  %s5492_s1 = sld [smem:[#allocation5_spill]] }
   0x4   :  { %v4470_v3 = vpack.c.bf16 %v64_v1, %v63_v0  ;;  %v66_v4 = vld [vmem:[%s5455_s3 + $0x18] sm:$0xff] }
   0x5   :  { %v4474_v6 = vpack.c.bf16 %v66_v4, %v65_v2 }
   0x9   :  { %v4819_v5 = vld [vmem:[%s5492_s1] sm:$0xff] }
   0xa   :  { %4184 = vmatprep.mubr.msk.f32.mxu0 %vm67_vm0, %v4819_v5 }
   0xb   :  { %22 = vsyncpa [#allocation3], 0  ;;  %4471 = vmatprep.subr.bf16.mxu0 %v4470_v3  ;;  %v4826_v7 = vld [vmem:[%s5492_s1 + $0x8] sm:$0xff]  ;;  %v4695_v8 = vmov 0.0   ;;  %vm4696_vm1 = vmmov 0   ;;  %s4697_s22 = smov 96  }
   0xc   :  { %4473 = vmatpush3.bf16.msra.mxu0 %v4470_v3  ;;  %4192 = vmatprep.subr.mxu1 %v4695_v8  ;;  %vm152_vm2 = vcmask 64512   ;;  %v4859_v14 = vld [vmem:[%s5454_s2] ss:$0 sm:$0xff]  ;;  %v4865_v19 = vld [vmem:[%s5454_s2 + $0x1] ss:$0 sm:$0xff]  ;;  %s4698_s27 = smov 64  }
   0xd   :  { %4475 = vmatprep.subr.bf16.mxu0 %v4474_v6  ;;  %4194 = vmatprep.mubr.msk.f32.mxu1 %vm4696_vm1, %v4695_v8  ;;  %s4699_s28 = smov 88   ;;  %s4700_s29 = smov 120   ;;  %vm1522_vm3 = vcmask 130048   ;;  %vm1525_vm4 = vcmask 195584   ;;  %vm1781_vm5 = vcmask 523264   ;;  %vm3755_vm6 = vcmask 1041409  }
   0xe   :  { %s4701_s0 = smov 56   ;;  %s5488_s30 = smov 80   ;;  %vm3918_vm7 = vcmask 9216  }
   0xf   :  { %s5486_s18 = smov 112   ;;  %s5476_s19 = smov 48  }
  0x10   :  { %4477 = vmatpush3.bf16.msra.mxu0 %v4474_v6  ;;  %s5474_s1 = smov 72   ;;  %s5472_s20 = smov 104  }
  0x11   :  { %4187 = vmatprep.subr.mxu0 %v4695_v8  ;;  %s5482_s21 = smov 40   ;;  %s5493_s25 = sld [smem:[#allocation6_spill]] }
  0x12   :  { %s5494_s23 = smov 80   ;;  %s5495_s24 = smov 112  }
  0x13   :  { %4185 = vmatmul.mubr.msk.f32.vlgmr.msra.gmra.mrb[0].mxu0 %vm67_vm0, %v4826_v7  ;;  %s5500_s26 = smov 8  }
  0x14   :  { %4189 = vmatprep.mubr.msk.f32.mxu0 %vm4696_vm1, %v4695_v8 }
  0xe6   :  { %v4836_v9 = vpop.f32.mrb[0].mxu0 }
  0xe7   :  { %v4838_v10 = vpop.f32.mrb[1].mxu0 }
  0xe8   :  { %150 = vrot.lane.b32.xlu0 %v4838_v10, %s4697_s22 }
  0xec   :  { %228 = vrot.lane.b32.xlu0 %v4836_v9, %s4697_s22 }
 0x15a   :  { %v151_v11 = vpop.permute.xlu0 %150 }
 0x15b   :  { %4188 = vmatpush3.xpose.msk.msra.mxu0 %vm152_vm2, %v151_v11 }
 0x15c   :  { %4197 = vmatprep.subr.mxu0 %v4695_v8 }
 0x15e   :  { %4190 = vmatmul.mubr.msk.f32.vlgmr.msra.gmra.mrb[2].mxu0 %vm152_vm2, %v4838_v10  ;;  %v229_v12 = vpop.permute.xlu0 %228 }
 0x15f   :  { %4193 = vmatpush3.xpose.msk.msra.mxu1 %vm152_vm2, %v229_v12  ;;  %4199 = vmatprep.mubr.msk.f32.mxu0 %vm4696_vm1, %v4695_v8 }
 0x160   :  { %4202 = vmatprep.subr.mxu1 %v4695_v8 }
 0x162   :  { %4195 = vmatmul.mubr.msk.f32.vlgmr.msra.gmra.mrb[0].mxu1 %vm152_vm2, %v4836_v9 }
 0x163   :  { %4204 = vmatprep.mubr.msk.f32.mxu1 %vm4696_vm1, %v4695_v8 }
 0x231   :  { %v223_v13 = vpop.f32.mrb[2].mxu0 }
 0x232   :  { %v304_v15 = vmul.f32 0.35355338, %v223_v13  ;;  %v4191_v16 = vpop.f32.mrb[3].mxu0 }
 0x234   :  { %v318_v17 = vadd.f32 %v4859_v14, %v304_v15 }
 0x235   :  { %v300_v18 = vpop.f32.mrb[0].mxu1 }
 0x236   :  { %v305_v20 = vmul.f32 0.35355338, %v300_v18  ;;  %v4196_v21 = vpop.f32.mrb[1].mxu1  ;;  %v320_v22 = vsel %vm152_vm2, %v318_v17, -inf }
 0x237   :  { %321 = vmax.xlane.f32.xlu1 %v320_v22 }
 0x238   :  { %v319_v23 = vadd.f32 %v4865_v19, %v305_v20 }
 0x23a   :  { %v323_v24 = vsel %vm152_vm2, %v319_v23, -inf }
 0x23b   :  { %324 = vmax.xlane.f32.xlu1 %v323_v24 }
 0x24c   :  { %342 = vrot.lane.b32.xlu1 %v4838_v10, %s4698_s27 }
 0x250   :  { %418 = vrot.lane.b32.xlu1 %v4836_v9, %s4698_s27 }
 0x254   :  { %496 = vrot.lane.b32.xlu1 %v4838_v10, %s4699_s28 }
 0x258   :  { %574 = vrot.lane.b32.xlu1 %v4836_v9, %s4699_s28 }
 0x2c4   :  { %v322_v25 = vpop.xlane.xlu1 %321 }
 0x2c5   :  { %v326_v26 = vsub.f32 %v318_v17, %v322_v25 }
 0x2c7   :  { %v328_v27 = vmul.f32 1.442695, %v326_v26 }
 0x2c8   :  { %v325_v28 = vpop.xlane.xlu1 %324 }
 0x2c9   :  { %4589 = vpow2.f32 %v328_v27  ;;  %v327_v29 = vsub.f32 %v319_v23, %v325_v28 }
 0x2cb   :  { %v330_v30 = vmul.f32 1.442695, %v327_v29 }
 0x2cc   :  { %v343_v31 = vpop.permute.xlu1 %342 }
 0x2cd   :  { %4591 = vpow2.f32 %v330_v30  ;;  %4198 = vmatpush3.msra.mxu0 %v343_v31 }
 0x2ce   :  { %4207 = vmatprep.subr.mxu0 %v4695_v8 }
 0x2d0   :  { %v419_v32 = vpop.permute.xlu1 %418 }
 0x2d1   :  { %4203 = vmatpush3.msra.mxu1 %v419_v32 }
 0x2d2   :  { %4212 = vmatprep.subr.mxu1 %v4695_v8 }
 0x2d3   :  { %v4590_v33 = vpop.eup %4589 }
 0x2d4   :  { %v332_v34 = vsel %vm152_vm2, %v4590_v33, 0.0  ;;  %v497_v37 = vpop.permute.xlu1 %496 }
 0x2d5   :  { %333 = vadd.xlane.f32.xlu0 %v332_v34 }
 0x2d7   :  { %v4592_v35 = vpop.eup %4591 }
 0x2d8   :  { %v335_v36 = vsel %vm152_vm2, %v4592_v35, 0.0  ;;  %v575_v38 = vpop.permute.xlu1 %574 }
 0x2d9   :  { %336 = vadd.xlane.f32.xlu1 %v335_v36 }
 0x2ea   :  { %572 = vrot.lane.b32.xlu1 %v4836_v9, %s4700_s29 }
 0x2eb   :  { %494 = vrot.lane.b32.xlu0 %v4838_v10, %s4700_s29 }
 0x362   :  { %v334_v39 = vpop.xlane.xlu0 %333 }
 0x363   :  { %4593 = vrcp.f32 %v334_v39 }
 0x366   :  { %v337_v40 = vpop.xlane.xlu1 %336  ;;  %v495_v45 = vpop.permute.xlu0 %494 }
 0x367   :  { %4595 = vrcp.f32 %v337_v40 }
 0x36a   :  { %v573_v46 = vpop.permute.xlu1 %572 }
 0x36d   :  { %v4594_v41 = vpop.eup %4593 }
 0x36e   :  { %v339_v42 = vmul.f32 %v4594_v41, %v4590_v33 }
 0x370   :  { %4200 = vmatmul.mubr.msk.f32.vlgmr.msra.gmra.mrb[4].mxu0 %vm152_vm2, %v339_v42 }
 0x371   :  { %v4596_v43 = vpop.eup %4595  ;;  %4208 = vmatpush3.xpose.msk.msra.mxu0 %vm152_vm2, %v497_v37  ;;  %4209 = vmatprep.mubr.msk.f32.mxu0 %vm4696_vm1, %v4695_v8 }
 0x372   :  { %v341_v44 = vmul.f32 %v4596_v43, %v4592_v35  ;;  %4217 = vmatprep.subr.mxu0 %v4695_v8 }
 0x374   :  { %4205 = vmatmul.mubr.msk.f32.vlgmr.msra.gmra.mrb[2].mxu1 %vm152_vm2, %v341_v44  ;;  %4210 = vmatmul.mubr.msk.f32.vlgmr.msra.gmra.mrb[6].mxu0 %vm152_vm2, %v495_v45 }
 0x375   :  { %4213 = vmatpush3.xpose.msk.msra.mxu1 %vm152_vm2, %v575_v38  ;;  %4214 = vmatprep.mubr.msk.f32.mxu1 %vm4696_vm1, %v4695_v8 }
 0x376   :  { %4222 = vmatprep.subr.mxu1 %v4695_v8  ;;  %4219 = vmatprep.mubr.msk.f32.mxu0 %vm4696_vm1, %v4695_v8 }
 0x378   :  { %4215 = vmatmul.mubr.msk.f32.vlgmr.msra.gmra.mrb[4].mxu1 %vm152_vm2, %v573_v46 }
 0x379   :  { %4224 = vmatprep.mubr.msk.f32.mxu1 %vm4696_vm1, %v4695_v8 }
 0x443   :  { %v4902_v47 = vpop.f32.mrb[4].mxu0 }
 0x444   :  { %v4201_v48 = vpop.f32.mrb[5].mxu0 }
 0x447   :  { %v4904_v49 = vpop.f32.mrb[2].mxu1  ;;  %v568_v50 = vpop.f32.mrb[6].mxu0 }
 0x448   :  { %v650_v51 = vmul.f32 0.35355338, %v568_v50  ;;  %v4206_v52 = vpop.f32.mrb[3].mxu1  ;;  %v4211_v53 = vpop.f32.mrb[7].mxu0 }
 0x44a   :  { %v652_v54 = vadd.f32 %v4859_v14, %v650_v51 }
 0x44b   :  { %v646_v55 = vpop.f32.mrb[4].mxu1 }
 0x44c   :  { %v651_v56 = vmul.f32 0.35355338, %v646_v55  ;;  %v4216_v57 = vpop.f32.mrb[5].mxu1  ;;  %v654_v58 = vsel %vm152_vm2, %v652_v54, -inf }
 0x44d   :  { %655 = vmax.xlane.f32.xlu1 %v654_v58 }
 0x44e   :  { %v653_v59 = vadd.f32 %v4865_v19, %v651_v56 }
 0x450   :  { %v657_v60 = vsel %vm152_vm2, %v653_v59, -inf }
 0x451   :  { %658 = vmax.xlane.f32.xlu0 %v657_v60 }
 0x45e   :  { %676 = vrot.lane.b32.xlu1 %v4838_v10, %s4701_s0 }
 0x462   :  { %830 = vrot.lane.b32.xlu1 %v4838_v10, %s5488_s30 }
 0x466   :  { %908 = vrot.lane.b32.xlu1 %v4836_v9, %s5488_s30 }
 0x467   :  { %752 = vrot.lane.b32.xlu0 %v4836_v9, %s4701_s0 }
 0x46b   :  { %828 = vrot.lane.b32.xlu0 %v4838_v10, %s5486_s18 }
 0x4da   :  { %v656_v61 = vpop.xlane.xlu1 %655 }
 0x4db   :  { %v660_v62 = vsub.f32 %v652_v54, %v656_v61 }
 0x4dd   :  { %v662_v2 = vmul.f32 1.442695, %v660_v62 }
 0x4de   :  { %v677_v63 = vpop.permute.xlu1 %676  ;;  %v659_v0 = vpop.xlane.xlu0 %658 }
 0x4df   :  { %v661_v1 = vsub.f32 %v653_v59, %v659_v0  ;;  %4218 = vmatpush3.msra.mxu0 %v677_v63  ;;  %v4707_v0 = vmov 0  }
 0x4e0   :  { %4227 = vmatprep.subr.mxu0 %v4695_v8  ;;  %4587 = vset.pattern.permute.xlu1 %v4707_v0 }
 0x4e1   :  { %v664_v3 = vmul.f32 1.442695, %v661_v1  ;;  %4588 = vset.pattern.permute.xlu0 %v4707_v0 }
 0x4e2   :  { %v753_v4 = vpop.permute.xlu0 %752  ;;  %v831_v15 = vpop.permute.xlu1 %830 }
 0x4e3   :  { %4597 = vpow2.f32 %v664_v3  ;;  %4223 = vmatpush3.msra.mxu1 %v753_v4 }
 0x4e4   :  { %4232 = vmatprep.subr.mxu1 %v4695_v8  ;;  %4599 = vpow2.f32 %v662_v2 }
 0x4e6   :  { %v909_v16 = vpop.permute.xlu1 %908  ;;  %v829_v25 = vpop.permute.xlu0 %828 }
 0x4ed   :  { %v4598_v6 = vpop.eup %4597 }
 0x4ee   :  { %v669_v11 = vsel %vm152_vm2, %v4598_v6, 0.0  ;;  %v4600_v12 = vpop.eup %4599 }
 0x4ef   :  { %670 = vadd.xlane.f32.xlu1 %v669_v11  ;;  %v666_v13 = vsel %vm152_vm2, %v4600_v12, 0.0 }
 0x4f3   :  { %667 = vadd.xlane.f32.xlu1 %v666_v13 }
 0x504   :  { %906 = vrot.lane.b32.xlu1 %v4836_v9, %s5486_s18 }
 0x57c   :  { %v671_v17 = vpop.xlane.xlu1 %670 }
 0x57d   :  { %4601 = vrcp.f32 %v671_v17 }
 0x580   :  { %v668_v18 = vpop.xlane.xlu1 %667 }
 0x581   :  { %4603 = vrcp.f32 %v668_v18 }
 0x584   :  { %v907_v24 = vpop.permute.xlu1 %906 }
 0x587   :  { %v4602_v20 = vpop.eup %4601 }
 0x588   :  { %v675_v21 = vmul.f32 %v4602_v20, %v4598_v6 }
 0x58a   :  { %4225 = vmatmul.mubr.msk.f32.vlgmr.msra.gmra.mrb[6].mxu1 %vm152_vm2, %v675_v21 }
 0x58b   :  { %v4604_v22 = vpop.eup %4603  ;;  %4233 = vmatpush3.xpose.msk.msra.mxu1 %vm152_vm2, %v909_v16  ;;  %4234 = vmatprep.mubr.msk.f32.mxu1 %vm4696_vm1, %v4695_v8 }
 0x58c   :  { %v673_v23 = vmul.f32 %v4604_v22, %v4600_v12  ;;  %4242 = vmatprep.subr.mxu1 %v4695_v8  ;;  %v59_v22 = vld [vmem:[%s5493_s25] sm:$0xff] }
 0x58e   :  { %4220 = vmatmul.mubr.msk.f32.vlgmr.msra.gmra.mrb[8].mxu0 %vm152_vm2, %v673_v23  ;;  %4235 = vmatmul.mubr.msk.f32.vlgmr.msra.gmra.mrb[8].mxu1 %vm152_vm2, %v907_v24  ;;  %v60_v23 = vld [vmem:[%s5493_s25 + $0x8] sm:$0xff]  ;;  %s5498_s25 = smov 104  }
 0x58f   :  { %4228 = vmatpush3.xpose.msk.msra.mxu0 %vm152_vm2, %v831_v15  ;;  %4229 = vmatprep.mubr.msk.f32.mxu0 %vm4696_vm1, %v4695_v8 }
 0x590   :  { %4237 = vmatprep.subr.mxu0 %v4695_v8  ;;  %4244 = vmatprep.mubr.msk.f32.mxu1 %vm4696_vm1, %v4695_v8 }
 0x592   :  { %4230 = vmatmul.mubr.msk.f32.vlgmr.msra.gmra.mrb[10].mxu0 %vm152_vm2, %v829_v25 }
 0x593   :  { %4239 = vmatprep.mubr.msk.f32.mxu0 %vm4696_vm1, %v4695_v8 }
 0x65d   :  { %v4942_v26 = vpop.f32.mrb[6].mxu1 }
 0x65e   :  { %v4226_v27 = vpop.f32.mrb[7].mxu1 }
 0x661   :  { %v4944_v28 = vpop.f32.mrb[8].mxu0  ;;  %v980_v29 = vpop.f32.mrb[8].mxu1 }
 0x662   :  { %v985_v30 = vmul.f32 0.35355338, %v980_v29  ;;  %v4221_v31 = vpop.f32.mrb[9].mxu0  ;;  %v4236_v32 = vpop.f32.mrb[9].mxu1 }
 0x664   :  { %v987_v33 = vadd.f32 %v4865_v19, %v985_v30 }
 0x665   :  { %v902_v34 = vpop.f32.mrb[10].mxu0 }
 0x666   :  { %v984_v35 = vmul.f32 0.35355338, %v902_v34  ;;  %v4231_v36 = vpop.f32.mrb[11].mxu0  ;;  %v991_v37 = vsel %vm152_vm2, %v987_v33, -inf }
 0x667   :  { %992 = vmax.xlane.f32.xlu1 %v991_v37 }
 0x668   :  { %v986_v38 = vadd.f32 %v4859_v14, %v984_v35 }
 0x66a   :  { %v988_v39 = vsel %vm152_vm2, %v986_v38, -inf }
 0x66b   :  { %989 = vmax.xlane.f32.xlu0 %v988_v39 }
 0x678   :  { %1010 = vrot.lane.b32.xlu1 %v4838_v10, %s5476_s19 }
 0x67c   :  { %1164 = vrot.lane.b32.xlu1 %v4838_v10, %s5474_s1 }
 0x680   :  { %1242 = vrot.lane.b32.xlu1 %v4836_v9, %s5474_s1  ;;  %s5480_s1 = smov 8  }
 0x681   :  { %1086 = vrot.lane.b32.xlu0 %v4836_v9, %s5476_s19  ;;  %s5478_s19 = smov 16  }
 0x684   :  { %1240 = vrot.lane.b32.xlu1 %v4836_v9, %s5472_s20 }
 0x6f4   :  { %v993_v40 = vpop.xlane.xlu1 %992 }
 0x6f5   :  { %v995_v41 = vsub.f32 %v987_v33, %v993_v40 }
 0x6f7   :  { %v998_v42 = vmul.f32 1.442695, %v995_v41 }
 0x6f8   :  { %v1011_v43 = vpop.permute.xlu1 %1010  ;;  %v990_v44 = vpop.xlane.xlu0 %989 }
 0x6f9   :  { %4605 = vpow2.f32 %v998_v42  ;;  %v994_v45 = vsub.f32 %v986_v38, %v990_v44  ;;  %4238 = vmatpush3.msra.mxu0 %v1011_v43  ;;  %v1542_v43 = vld [vmem:[%s5456_s4 + $0x10] sm:$0xff]  ;;  %v1543_v44 = vld [vmem:[%s5456_s4 + $0x18] sm:$0xff] }
 0x6fa   :  { %4247 = vmatprep.subr.mxu0 %v4695_v8 }
 0x6fb   :  { %v996_v46 = vmul.f32 1.442695, %v994_v45  ;;  %v4482_v45 = vpack.c.bf16 %v1543_v44, %v1542_v43  ;;  %v3964_v43 = vld [vmem:[%s5457_s5] ss:$0 sm:$0xff] }
 0x6fc   :  { %v1087_v48 = vpop.permute.xlu0 %1086  ;;  %v1165_v56 = vpop.permute.xlu1 %1164 }
 0x6fd   :  { %4607 = vpow2.f32 %v996_v46  ;;  %4243 = vmatpush3.msra.mxu1 %v1087_v48 }
 0x6fe   :  { %4252 = vmatprep.subr.mxu1 %v4695_v8 }
 0x700   :  { %v1243_v58 = vpop.permute.xlu1 %1242 }
 0x703   :  { %v4606_v50 = vpop.eup %4605 }
 0x704   :  { %v1003_v51 = vsel %vm152_vm2, %v4606_v50, 0.0  ;;  %v1241_v62 = vpop.permute.xlu1 %1240 }
 0x705   :  { %1004 = vadd.xlane.f32.xlu0 %v1003_v51 }
 0x707   :  { %v4608_v52 = vpop.eup %4607 }
 0x708   :  { %v1000_v53 = vsel %vm152_vm2, %v4608_v52, 0.0 }
 0x709   :  { %1001 = vadd.xlane.f32.xlu0 %v1000_v53 }
 0x71f   :  { %1162 = vrot.lane.b32.xlu0 %v4838_v10, %s5472_s20  ;;  %s5484_s20 = smov 24  }
 0x792   :  { %v1005_v54 = vpop.xlane.xlu0 %1004 }
 0x793   :  { %4609 = vrcp.f32 %v1005_v54 }
 0x796   :  { %v1002_v55 = vpop.xlane.xlu0 %1001 }
 0x797   :  { %4611 = vrcp.f32 %v1002_v55 }
 0x79a   :  { %v1163_v63 = vpop.permute.xlu0 %1162 }
 0x79d   :  { %v4610_v57 = vpop.eup %4609 }
 0x79e   :  { %v1009_v59 = vmul.f32 %v4610_v57, %v4606_v50 }
 0x7a0   :  { %4245 = vmatmul.mubr.msk.f32.vlgmr.msra.gmra.mrb[10].mxu1 %vm152_vm2, %v1009_v59 }
 0x7a1   :  { %v4612_v60 = vpop.eup %4611  ;;  %4253 = vmatpush3.xpose.msk.msra.mxu1 %vm152_vm2, %v1243_v58  ;;  %4254 = vmatprep.mubr.msk.f32.mxu1 %vm4696_vm1, %v4695_v8 }
 0x7a2   :  { %v1007_v61 = vmul.f32 %v4612_v60, %v4608_v52  ;;  %4262 = vmatprep.subr.mxu1 %v4695_v8 }
 0x7a4   :  { %4240 = vmatmul.mubr.msk.f32.vlgmr.msra.gmra.mrb[12].mxu0 %vm152_vm2, %v1007_v61  ;;  %4255 = vmatmul.mubr.msk.f32.vlgmr.msra.gmra.mrb[12].mxu1 %vm152_vm2, %v1241_v62 }
 0x7a5   :  { %4248 = vmatpush3.xpose.msk.msra.mxu0 %vm152_vm2, %v1165_v56  ;;  %4249 = vmatprep.mubr.msk.f32.mxu0 %vm4696_vm1, %v4695_v8 }
 0x7a6   :  { %4257 = vmatprep.subr.mxu0 %v4695_v8  ;;  %4264 = vmatprep.mubr.msk.f32.mxu1 %vm4696_vm1, %v4695_v8 }
 0x7a8   :  { %4250 = vmatmul.mubr.msk.f32.vlgmr.msra.gmra.mrb[14].mxu0 %vm152_vm2, %v1163_v63 }
 0x7a9   :  { %4259 = vmatprep.mubr.msk.f32.mxu0 %vm4696_vm1, %v4695_v8 }
 0x873   :  { %v1158_v1 = vpop.f32.mrb[10].mxu1 }
 0x874   :  { %v4246_v2 = vpop.f32.mrb[11].mxu1 }
 0x877   :  { %v1082_v3 = vpop.f32.mrb[12].mxu0  ;;  %v1314_v4 = vpop.f32.mrb[12].mxu1 }
 0x878   :  { %v1319_v6 = vmul.f32 0.35355338, %v1314_v4  ;;  %v4241_v11 = vpop.f32.mrb[13].mxu0  ;;  %v4256_v12 = vpop.f32.mrb[13].mxu1 }
 0x87a   :  { %v1321_v13 = vadd.f32 %v4865_v19, %v1319_v6 }
 0x87b   :  { %v1236_v15 = vpop.f32.mrb[14].mxu0 }
 0x87c   :  { %v1318_v16 = vmul.f32 0.35355338, %v1236_v15  ;;  %v4251_v17 = vpop.f32.mrb[15].mxu0  ;;  %v1325_v18 = vsel %vm152_vm2, %v1321_v13, -inf }
 0x87d   :  { %1326 = vmax.xlane.f32.xlu1 %v1325_v18 }
 0x87e   :  { %v1320_v20 = vadd.f32 %v4859_v14, %v1318_v16 }
 0x880   :  { %v1322_v21 = vsel %vm152_vm2, %v1320_v20, -inf }
 0x881   :  { %1323 = vmax.xlane.f32.xlu0 %v1322_v21 }
 0x88e   :  { %1344 = vrot.lane.b32.xlu1 %v4838_v10, %s5482_s21 }
 0x892   :  { %1530 = vperm.xlu1 %4587, %v59_v22  }
 0x896   :  { %1535 = vperm.xlu1 %4587, %v60_v23  }
 0x89a   :  { %1500 = vrot.lane.b32.xlu1 %v4942_v26, %s5480_s1 }
 0x89e   :  { %1508 = vrot.lane.b32.xlu1 %v1158_v1, %s5478_s19 }
 0x90a   :  { %v1327_v24 = vpop.xlane.xlu1 %1326 }
 0x90b   :  { %v1329_v25 = vsub.f32 %v1321_v13, %v1327_v24  ;;  %v1673_v24 = vld [vmem:[%s5459_s7 + $0x8] sm:$0xff] }
 0x90d   :  { %v1332_v10 = vmul.f32 1.442695, %v1329_v25 }
 0x90e   :  { %v1345_v27 = vpop.permute.xlu1 %1344  ;;  %v1324_v29 = vpop.xlane.xlu0 %1323 }
 0x90f   :  { %4613 = vpow2.f32 %v1332_v10  ;;  %v1328_v30 = vsub.f32 %v1320_v20, %v1324_v29  ;;  %4258 = vmatpush3.msra.mxu0 %v1345_v27  ;;  %v1674_v10 = vld [vmem:[%s5459_s7 + $0x10] sm:$0xff]  ;;  %v1675_v27 = vld [vmem:[%s5459_s7 + $0x18] sm:$0xff] }
 0x910   :  { %v4490_v29 = vpack.c.bf16 %v1675_v27, %v1674_v10  ;;  %v3976_v27 = vld [vmem:[%s5455_s3 + $0x30] sm:$0xff] }
 0x911   :  { %v1330_v31 = vmul.f32 1.442695, %v1328_v30  ;;  %v1766_v30 = vld [vmem:[%s5461_s9] sm:$0xff] }
 0x912   :  { %v5020_v52 = vpop.permute.xlu1 %1530 }
 0x913   :  { %4615 = vpow2.f32 %v1330_v31  ;;  %v1767_v31 = vld [vmem:[%s5461_s9 + $0x8] sm:$0xff] }
 0x916   :  { %v5022_v53 = vpop.permute.xlu1 %1535 }
 0x919   :  { %v4614_v32 = vpop.eup %4613 }
 0x91a   :  { %v1337_v33 = vsel %vm152_vm2, %v4614_v32, 0.0  ;;  %v1501_v54 = vpop.permute.xlu1 %1500 }
 0x91b   :  { %1338 = vadd.xlane.f32.xlu0 %v1337_v33  ;;  %v1521_v59 = vsel %vm152_vm2, %v4904_v49, %v1501_v54  ;;  %v4494_v33 = vpack.c.bf16 %v1767_v31, %v1766_v30 }
 0x91d   :  { %v4616_v34 = vpop.eup %4615 }
 0x91e   :  { %v1334_v26 = vsel %vm152_vm2, %v4616_v34, 0.0  ;;  %v1509_v56 = vpop.permute.xlu1 %1508 }
 0x91f   :  { %1335 = vadd.xlane.f32.xlu0 %v1334_v26  ;;  %v1524_v60 = vsel %vm1522_vm3, %v1521_v59, %v1509_v56  ;;  %v1772_v56 = vld [vmem:[%s5461_s9 + $0x30] sm:$0xff]  ;;  %v3966_v59 = vld [vmem:[%s5460_s8] ss:$0 sm:$0xff] }
 0x935   :  { %1420 = vrot.lane.b32.xlu0 %v4836_v9, %s5482_s21  ;;  %v1540_v9 = vld [vmem:[%s5456_s4] sm:$0xff]  ;;  %s4713_s21 = smov [#allocation2]  }
 0x939   :  { %1498 = vrot.lane.b32.xlu0 %v4944_v28, %s5480_s1  ;;  %v1541_v28 = vld [vmem:[%s5456_s4 + $0x8] sm:$0xff] }
 0x93a   :  { %v4478_v42 = vpack.c.bf16 %v1541_v28, %v1540_v9 }
 0x93c   :  { %4479 = vmatprep.subr.bf16.mxu0 %v4478_v42 }
 0x93d   :  { %1506 = vrot.lane.b32.xlu0 %v1082_v3, %s5478_s19  ;;  %s5501_s19 = smov 16  }
 0x9a8   :  { %v1339_v35 = vpop.xlane.xlu0 %1338 }
 0x9a9   :  { %4617 = vrcp.f32 %v1339_v35  ;;  %v1770_v35 = vld [vmem:[%s5461_s9 + $0x20] sm:$0xff] }
 0x9ac   :  { %v1336_v36 = vpop.xlane.xlu0 %1335 }
 0x9ad   :  { %4619 = vrcp.f32 %v1336_v36  ;;  %v1771_v36 = vld [vmem:[%s5461_s9 + $0x28] sm:$0xff] }
 0x9b0   :  { %v1421_v37 = vpop.permute.xlu0 %1420 }
 0x9b1   :  { %4263 = vmatpush3.msra.mxu1 %v1421_v37  ;;  %v4502_v37 = vpack.c.bf16 %v1771_v36, %v1770_v35 }
 0x9b3   :  { %v4618_v38 = vpop.eup %4617 }
 0x9b4   :  { %v1343_v39 = vmul.f32 %v4618_v38, %v4614_v32  ;;  %v1499_v55 = vpop.permute.xlu0 %1498  ;;  %v1768_v32 = vld [vmem:[%s5461_s9 + $0x10] sm:$0xff] }
 0x9b5   :  { %v1520_v61 = vsel %vm152_vm2, %v4902_v47, %v1499_v55 }
 0x9b6   :  { %4265 = vmatmul.mubr.msk.f32.vlgmr.msra.gmra.mrb[14].mxu1 %vm152_vm2, %v1343_v39 }
 0x9b7   :  { %v4620_v40 = vpop.eup %4619 }
 0x9b8   :  { %v1341_v41 = vmul.f32 %v4620_v40, %v4616_v34  ;;  %v1507_v57 = vpop.permute.xlu0 %1506  ;;  %v1769_v34 = vld [vmem:[%s5461_s9 + $0x18] sm:$0xff] }
 0x9b9   :  { %v1523_v62 = vsel %vm1522_vm3, %v1520_v61, %v1507_v57  ;;  %v4498_v26 = vpack.c.bf16 %v1769_v34, %v1768_v32  ;;  %v1773_v57 = vld [vmem:[%s5461_s9 + $0x38] sm:$0xff] }
 0x9ba   :  { %4260 = vmatmul.mubr.msk.f32.vlgmr.msra.gmra.mrb[16].mxu0 %vm152_vm2, %v1341_v41 }
 0x9bb   :  { %4481 = vmatpush3.bf16.msra.mxu0 %v4478_v42 }
 0x9bc   :  { %4483 = vmatprep.subr.bf16.mxu0 %v4482_v45 }
 0x9bf   :  { %4485 = vmatpush3.bf16.msra.mxu0 %v4482_v45  ;;  %v3965_v45 = vld [vmem:[%s5458_s6] ss:$0 sm:$0xff] }
 0x9c0   :  { %4495 = vmatprep.subr.bf16.mxu0 %v4494_v33 }
 0xa89   :  { %v1492_v46 = vpop.f32.mrb[14].mxu1 }
 0xa8a   :  { %1516 = vrot.lane.b32.xlu1 %v1492_v46, %s5484_s20  ;;  %v4266_v48 = vpop.f32.mrb[15].mxu1 }
 0xa8d   :  { %v1416_v50 = vpop.f32.mrb[16].mxu0 }
 0xa8e   :  { %1514 = vrot.lane.b32.xlu0 %v1416_v50, %s5484_s20  ;;  %v4261_v51 = vpop.f32.mrb[17].mxu0  ;;  %s5499_s20 = smov 40  }
 0xafc   :  { %v1517_v58 = vpop.permute.xlu1 %1516 }
 0xafd   :  { %v1527_v63 = vsel %vm1525_vm4, %v1524_v60, %v1517_v58  ;;  %v4506_v58 = vpack.c.bf16 %v1773_v57, %v1772_v56 }
 0xafe   :  { %v1539_v3 = vmul.f32 %v5022_v53, %v1527_v63 }
 0xb00   :  { %v1515_v0 = vpop.permute.xlu0 %1514 }
 0xb01   :  { %v1526_v1 = vsel %vm1525_vm4, %v1523_v62, %v1515_v0 }
 0xb02   :  { %v1538_v2 = vmul.f32 %v5020_v52, %v1526_v1 }
 0xb04   :  { %4275 = vmatprep.mubr.msk.f32.mxu0 %vm67_vm0, %v1538_v2  ;;  %v3969_v2 = vld [vmem:[%s5462_s10] ss:$0 sm:$0xff] }
 0xb05   :  { %4276 = vmatmul.mubr.msk.f32.vlgmr.msra.gmra.mrb[18].mxu0 %vm67_vm0, %v1539_v3 }
 0xb06   :  { %4497 = vmatpush3.bf16.msra.mxu0 %v4494_v33 }
 0xb07   :  { %4499 = vmatprep.subr.bf16.mxu0 %v4498_v26 }
 0xb0a   :  { %4501 = vmatpush3.bf16.msra.mxu0 %v4498_v26 }
 0xb0b   :  { %4503 = vmatprep.subr.bf16.mxu0 %v4502_v37 }
 0xb0e   :  { %4505 = vmatpush3.bf16.msra.mxu0 %v4502_v37  ;;  %v3972_v37 = vld [vmem:[%s5463_s11] ss:$0 sm:$0xff] }
 0xb0f   :  { %4507 = vmatprep.subr.bf16.mxu0 %v4506_v58 }
 0xb12   :  { %4509 = vmatpush3.bf16.msra.mxu0 %v4506_v58 }
 0xb13   :  { %4329 = vmatprep.subr.mxu0 %v4695_v8 }
 0xbd8   :  { %v4277_v49 = vpop.f32.mrb[18].mxu0 }
 0xbd9   :  { %v1626_v4 = vadd.f32 %v4277_v49, %v4826_v7  ;;  %v1616_v6 = vpop.f32.mrb[19].mxu0 }
 0xbda   :  { %v1625_v47 = vadd.f32 %v1616_v6, %v4819_v5  ;;  %v1672_v5 = vld [vmem:[%s5459_s7] sm:$0xff] }
 0xbdb   :  { %v1632_v11 = vsel %vm67_vm0, %v1626_v4, 0.0  ;;  %v4486_v25 = vpack.c.bf16 %v1673_v24, %v1672_v5  ;;  %v3974_v24 = vld [vmem:[%s5455_s3 + $0x20] sm:$0xff] }
 0xbdc   :  { %1633 = vadd.xlane.f32.xlu1 %v1632_v11  ;;  %v1629_v12 = vsel %vm67_vm0, %v1625_v47, 0.0 }
 0xbdd   :  { %1630 = vadd.xlane.f32.xlu0 %v1629_v12  ;;  %4487 = vmatprep.subr.bf16.mxu1 %v4486_v25 }
 0xbde   :  { %4489 = vmatpush3.bf16.msra.mxu1 %v4486_v25  ;;  %v3975_v25 = vld [vmem:[%s5455_s3 + $0x28] sm:$0xff] }
 0xbdf   :  { %4491 = vmatprep.subr.bf16.mxu1 %v4490_v29  ;;  %v4510_v10 = vpack.c.bf16 %v3975_v25, %v3974_v24 }
 0xbe2   :  { %4493 = vmatpush3.bf16.msra.mxu1 %v4490_v29  ;;  %v3977_v29 = vld [vmem:[%s5455_s3 + $0x38] sm:$0xff] }
 0xbe3   :  { %v4514_v30 = vpack.c.bf16 %v3977_v29, %v3976_v27  ;;  %4511 = vmatprep.subr.bf16.mxu1 %v4510_v10 }
 0xc69   :  { %v1634_v13 = vpop.xlane.xlu1 %1633 }
 0xc6a   :  { %v1637_v15 = vmul.f32 0.03125, %v1634_v13  ;;  %v1631_v16 = vpop.xlane.xlu0 %1630 }
 0xc6b   :  { %v1636_v17 = vmul.f32 0.03125, %v1631_v16 }
 0xc6c   :  { %v1639_v18 = vsub.f32 %v1626_v4, %v1637_v15 }
 0xc6d   :  { %v1638_v20 = vsub.f32 %v1625_v47, %v1636_v17 }
 0xc6e   :  { %v1641_v23 = vmul.f32 %v1639_v18, %v1639_v18 }
 0xc6f   :  { %v1640_v21 = vmul.f32 %v1638_v20, %v1638_v20 }
 0xc70   :  { %v1645_v7 = vsel %vm67_vm0, %v1641_v23, 0.0 }
 0xc71   :  { %v1642_v22 = vsel %vm67_vm0, %v1640_v21, 0.0 }
 0xc72   :  { %1643 = vadd.xlane.f32.xlu0 %v1642_v22 }
 0xc76   :  { %1646 = vadd.xlane.f32.xlu0 %v1645_v7 }
 0xcff   :  { %v1644_v38 = vpop.xlane.xlu0 %1643 }
 0xd00   :  { %v1648_v39 = vmul.f32 0.03125, %v1644_v38 }
 0xd02   :  { %v1650_v40 = vadd.f32 1e-05, %v1648_v39 }
 0xd03   :  { %v1647_v41 = vpop.xlane.xlu0 %1646 }
 0xd04   :  { %4621 = vrsqrt.f32 %v1650_v40  ;;  %v1649_v9 = vmul.f32 0.03125, %v1647_v41  ;;  %v3973_v41 = vld [vmem:[%s5464_s12] ss:$0 sm:$0xff] }
 0xd06   :  { %v1651_v28 = vadd.f32 1e-05, %v1649_v9 }
 0xd08   :  { %4623 = vrsqrt.f32 %v1651_v28 }
 0xd0e   :  { %v4622_v42 = vpop.eup %4621 }
 0xd0f   :  { %v1654_v44 = vmul.f32 %v4622_v42, %v1638_v20 }
 0xd11   :  { %v1662_v46 = vmul.f32 %v3964_v43, %v1654_v44 }
 0xd12   :  { %v4624_v48 = vpop.eup %4623 }
 0xd13   :  { %v1655_v50 = vmul.f32 %v4624_v48, %v1639_v18  ;;  %v1670_v51 = vadd.f32 %v3965_v45, %v1662_v46 }
 0xd15   :  { %v1663_v54 = vmul.f32 %v3964_v43, %v1655_v50  ;;  %4286 = vmatprep.mubr.msk.f32.mxu1 %vm67_vm0, %v1670_v51 }
 0xd17   :  { %v1671_v55 = vadd.f32 %v3965_v45, %v1663_v54 }
 0xd19   :  { %4287 = vmatmul.mubr.msk.f32.vlgmr.msra.gmra.mrb[16].mxu1 %vm67_vm0, %v1671_v55 }
 0xd1a   :  { %4513 = vmatpush3.bf16.msra.mxu1 %v4510_v10 }
 0xd1b   :  { %4515 = vmatprep.subr.bf16.mxu1 %v4514_v30 }
 0xd1e   :  { %4517 = vmatpush3.bf16.msra.mxu1 %v4514_v30 }
 0xd1f   :  { %4319 = vmatprep.subr.mxu1 %v4695_v8 }
 0xdec   :  { %v4288_v60 = vpop.f32.mrb[16].mxu1 }
 0xded   :  { %v1761_v61 = vadd.f32 %v4288_v60, %v3966_v59  ;;  %v1755_v62 = vpop.f32.mrb[17].mxu1 }
 0xdee   :  { %v1756_v63 = vadd.f32 %v3966_v59, %v1755_v62 }
 0xdef   :  { %v1765_v1 = vmax.f32 %v1761_v61, 0.0 }
 0xdf0   :  { %v1764_v0 = vmax.f32 %v1756_v63, 0.0 }
 0xdf2   :  { %4305 = vmatprep.mubr.msk.f32.mxu0 %vm1781_vm5, %v1764_v0 }
 0xdf3   :  { %4306 = vmatmul.mubr.msk.f32.vlgmr.msra.gmra.mrb[20].mxu0 %vm1781_vm5, %v1765_v1 }
 0xdf4   :  { %4331 = vmatprep.mubr.msk.f32.mxu0 %vm4696_vm1, %v4695_v8 }
 0xec6   :  { %v4307_v3 = vpop.f32.mrb[20].mxu0 }
 0xec7   :  { %v1860_v49 = vadd.f32 %v4307_v3, %v3969_v2  ;;  %v1854_v4 = vpop.f32.mrb[21].mxu0 }
 0xec8   :  { %v1855_v6 = vadd.f32 %v3969_v2, %v1854_v4 }
 0xec9   :  { %v1864_v47 = vadd.f32 %v1860_v49, %v1671_v55 }
 0xeca   :  { %v1863_v11 = vadd.f32 %v1855_v6, %v1670_v51 }
 0xecb   :  { %v1870_v12 = vsel %vm67_vm0, %v1864_v47, 0.0 }
 0xecc   :  { %1871 = vadd.xlane.f32.xlu0 %v1870_v12  ;;  %v1867_v13 = vsel %vm67_vm0, %v1863_v11, 0.0 }
 0xecd   :  { %1868 = vadd.xlane.f32.xlu1 %v1867_v13 }
 0xf59   :  { %v1872_v15 = vpop.xlane.xlu0 %1871 }
 0xf5a   :  { %v1874_v16 = vmul.f32 0.03125, %v1872_v15  ;;  %v1869_v17 = vpop.xlane.xlu1 %1868 }
 0xf5b   :  { %v1873_v18 = vmul.f32 0.03125, %v1869_v17 }
 0xf5c   :  { %v1876_v20 = vsub.f32 %v1864_v47, %v1874_v16 }
 0xf5d   :  { %v1875_v21 = vsub.f32 %v1863_v11, %v1873_v18 }
 0xf5e   :  { %v1878_v22 = vmul.f32 %v1876_v20, %v1876_v20 }
 0xf5f   :  { %v1877_v23 = vmul.f32 %v1875_v21, %v1875_v21 }
 0xf60   :  { %v1882_v7 = vsel %vm67_vm0, %v1878_v22, 0.0 }
 0xf61   :  { %1883 = vadd.xlane.f32.xlu0 %v1882_v7  ;;  %v1879_v5 = vsel %vm67_vm0, %v1877_v23, 0.0 }
 0xf62   :  { %1880 = vadd.xlane.f32.xlu1 %v1879_v5 }
 0xfee   :  { %v1884_v31 = vpop.xlane.xlu0 %1883 }
 0xfef   :  { %v1886_v32 = vmul.f32 0.03125, %v1884_v31  ;;  %v1881_v33 = vpop.xlane.xlu1 %1880  ;;  %v5195_v31 = vld [vmem:[%s5454_s2] ss:$0 sm:$0xff] }
 0xff0   :  { %v1885_v34 = vmul.f32 0.03125, %v1881_v33 }
 0xff1   :  { %v1888_v26 = vadd.f32 1e-05, %v1886_v32 }
 0xff2   :  { %v1887_v35 = vadd.f32 1e-05, %v1885_v34 }
 0xff3   :  { %4625 = vrsqrt.f32 %v1888_v26 }
 0xff4   :  { %4627 = vrsqrt.f32 %v1887_v35 }
 0xffd   :  { %v4626_v36 = vpop.eup %4625 }
 0xffe   :  { %v4628_v38 = vpop.eup %4627  ;;  %v1892_v39 = vmul.f32 %v4626_v36, %v1876_v20  ;;  %v5202_v36 = vld [vmem:[%s5454_s2 + $0x1] ss:$0 sm:$0xff]  ;;  %s5496_s2 = smov 48  }
 0xfff   :  { %v1891_v40 = vmul.f32 %v4628_v38, %v1875_v21 }
0x1000   :  { %v1900_v9 = vmul.f32 %v3972_v37, %v1892_v39 }
0x1001   :  { %v1899_v28 = vmul.f32 %v3972_v37, %v1891_v40 }
0x1002   :  { %v1908_v42 = vadd.f32 %v3973_v41, %v1900_v9 }
0x1003   :  { %v1907_v43 = vadd.f32 %v3973_v41, %v1899_v28 }
0x1004   :  { %v5124_v45 = vmul.f32 %v1908_v42, %v5022_v53 }
0x1005   :  { %v5121_v44 = vmul.f32 %v1907_v43, %v5020_v52 }
0x1007   :  { %4316 = vmatprep.mubr.msk.f32.mxu1 %vm67_vm0, %v5121_v44 }
0x1008   :  { %4317 = vmatmul.mubr.msk.f32.vlgmr.msra.gmra.mrb[18].mxu1 %vm67_vm0, %v5124_v45 }
0x1009   :  { %4321 = vmatprep.mubr.msk.f32.mxu1 %vm4696_vm1, %v4695_v8 }
0x10db   :  { %v5132_v46 = vpop.f32.mrb[18].mxu1 }
0x10dc   :  { %2075 = vrot.lane.b32.xlu0 %v5132_v46, %s4697_s22  ;;  %v5136_v48 = vpop.f32.mrb[19].mxu1 }
0x10dd   :  { %1998 = vrot.lane.b32.xlu1 %v5136_v48, %s4697_s22  ;;  %s3926_s22 = sshll.u32 %s4713_s21, 4  ;;  %s3927_s22 = int_to_ptr.vmem [resolvable:$true] %s3926_s22 }
0x10de   :  { %p4676_p1 = scmp.lt.s32.totalorder %s3927_s22, %s3927_s22 }
0x114e   :  { %v2076_v51 = vpop.permute.xlu0 %2075 }
0x114f   :  { %v1999_v50 = vpop.permute.xlu1 %1998 }
0x1150   :  { %4320 = vmatpush3.xpose.msk.msra.mxu1 %vm152_vm2, %v1999_v50 }
0x1151   :  { %4324 = vmatprep.subr.mxu1 %v4695_v8 }
0x1153   :  { %4322 = vmatmul.mubr.msk.f32.vlgmr.msra.gmra.mrb[20].mxu1 %vm152_vm2, %v5136_v48 }
0x1154   :  { %4325 = vmatpush3.xpose.msk.msra.mxu1 %vm152_vm2, %v2076_v51  ;;  %4326 = vmatprep.mubr.msk.f32.mxu1 %vm4696_vm1, %v4695_v8 }
0x1155   :  { %4334 = vmatprep.subr.mxu1 %v4695_v8 }
0x1157   :  { %4327 = vmatmul.mubr.msk.f32.vlgmr.msra.gmra.mrb[22].mxu1 %vm152_vm2, %v5132_v46 }
0x1158   :  { %4336 = vmatprep.mubr.msk.f32.mxu1 %vm4696_vm1, %v4695_v8 }
0x1226   :  { %v2070_v54 = vpop.f32.mrb[20].mxu1 }
0x1227   :  { %v2151_v55 = vmul.f32 0.35355338, %v2070_v54  ;;  %v4323_v56 = vpop.f32.mrb[21].mxu1 }
0x1229   :  { %v2153_v57 = vadd.f32 %v4859_v14, %v2151_v55 }
0x122a   :  { %v2147_v58 = vpop.f32.mrb[22].mxu1 }
0x122b   :  { %v2152_v59 = vmul.f32 0.35355338, %v2147_v58  ;;  %v4328_v60 = vpop.f32.mrb[23].mxu1  ;;  %v2155_v61 = vsel %vm152_vm2, %v2153_v57, -inf }
0x122c   :  { %2156 = vmax.xlane.f32.xlu1 %v2155_v61 }
0x122d   :  { %v2154_v62 = vadd.f32 %v4865_v19, %v2152_v59 }
0x122f   :  { %v2158_v63 = vsel %vm152_vm2, %v2154_v62, -inf }
0x1230   :  { %2159 = vmax.xlane.f32.xlu0 %v2158_v63 }
0x123d   :  { %2177 = vrot.lane.b32.xlu1 %v5136_v48, %s4698_s27 }
0x1241   :  { %2331 = vrot.lane.b32.xlu1 %v5136_v48, %s4699_s28 }
0x1245   :  { %2409 = vrot.lane.b32.xlu1 %v5132_v46, %s4699_s28 }
0x1246   :  { %2253 = vrot.lane.b32.xlu0 %v5132_v46, %s4698_s27 }
0x12b9   :  { %v2157_v14 = vpop.xlane.xlu1 %2156 }
0x12ba   :  { %v2161_v0 = vsub.f32 %v2153_v57, %v2157_v14 }
0x12bc   :  { %v2163_v1 = vmul.f32 1.442695, %v2161_v0 }
0x12bd   :  { %v2178_v2 = vpop.permute.xlu1 %2177  ;;  %v2160_v19 = vpop.xlane.xlu0 %2159 }
0x12be   :  { %4629 = vpow2.f32 %v2163_v1  ;;  %v2162_v3 = vsub.f32 %v2154_v62, %v2160_v19  ;;  %4330 = vmatpush3.msra.mxu0 %v2178_v2 }
0x12bf   :  { %4339 = vmatprep.subr.mxu0 %v4695_v8 }
0x12c0   :  { %v2165_v49 = vmul.f32 1.442695, %v2162_v3 }
0x12c1   :  { %v2254_v4 = vpop.permute.xlu0 %2253  ;;  %v2332_v13 = vpop.permute.xlu1 %2331 }
0x12c2   :  { %4631 = vpow2.f32 %v2165_v49  ;;  %4335 = vmatpush3.msra.mxu1 %v2254_v4 }
0x12c3   :  { %4344 = vmatprep.subr.mxu1 %v4695_v8 }
0x12c5   :  { %v2410_v15 = vpop.permute.xlu1 %2409 }
0x12c8   :  { %v4630_v6 = vpop.eup %4629 }
0x12c9   :  { %v2167_v47 = vsel %vm152_vm2, %v4630_v6, 0.0 }
0x12ca   :  { %2168 = vadd.xlane.f32.xlu1 %v2167_v47 }
0x12cc   :  { %v4632_v11 = vpop.eup %4631 }
0x12cd   :  { %v2170_v12 = vsel %vm152_vm2, %v4632_v11, 0.0 }
0x12ce   :  { %2171 = vadd.xlane.f32.xlu0 %v2170_v12 }
0x12db   :  { %2407 = vrot.lane.b32.xlu1 %v5132_v46, %s4700_s29 }
0x12e4   :  { %2329 = vrot.lane.b32.xlu0 %v5136_v48, %s4700_s29  ;;  %s5502_s29 = smov 24  }
0x1357   :  { %v2169_v16 = vpop.xlane.xlu1 %2168 }
0x1358   :  { %4633 = vrcp.f32 %v2169_v16 }
0x135b   :  { %v2172_v17 = vpop.xlane.xlu0 %2171  ;;  %v2408_v7 = vpop.permute.xlu1 %2407 }
0x135c   :  { %4635 = vrcp.f32 %v2172_v17 }
0x135f   :  { %v2330_v23 = vpop.permute.xlu0 %2329 }
0x1362   :  { %v4634_v18 = vpop.eup %4633 }
0x1363   :  { %v2174_v20 = vmul.f32 %v4634_v18, %v4630_v6 }
0x1365   :  { %4332 = vmatmul.mubr.msk.f32.vlgmr.msra.gmra.mrb[22].mxu0 %vm152_vm2, %v2174_v20 }
0x1366   :  { %v4636_v21 = vpop.eup %4635  ;;  %4340 = vmatpush3.xpose.msk.msra.mxu0 %vm152_vm2, %v2332_v13  ;;  %4341 = vmatprep.mubr.msk.f32.mxu0 %vm4696_vm1, %v4695_v8 }
0x1367   :  { %v2176_v22 = vmul.f32 %v4636_v21, %v4632_v11  ;;  %4349 = vmatprep.subr.mxu0 %v4695_v8 }
0x1369   :  { %4337 = vmatmul.mubr.msk.f32.vlgmr.msra.gmra.mrb[24].mxu1 %vm152_vm2, %v2176_v22  ;;  %4342 = vmatmul.mubr.msk.f32.vlgmr.msra.gmra.mrb[24].mxu0 %vm152_vm2, %v2330_v23 }
0x136a   :  { %4345 = vmatpush3.xpose.msk.msra.mxu1 %vm152_vm2, %v2410_v15  ;;  %4346 = vmatprep.mubr.msk.f32.mxu1 %vm4696_vm1, %v4695_v8 }
0x136b   :  { %4354 = vmatprep.subr.mxu1 %v4695_v8  ;;  %4351 = vmatprep.mubr.msk.f32.mxu0 %vm4696_vm1, %v4695_v8 }
0x136d   :  { %4347 = vmatmul.mubr.msk.f32.vlgmr.msra.gmra.mrb[26].mxu1 %vm152_vm2, %v2408_v7 }
0x136e   :  { %4356 = vmatprep.mubr.msk.f32.mxu1 %vm4696_vm1, %v4695_v8 }
0x1438   :  { %v5188_v5 = vpop.f32.mrb[22].mxu0 }
0x1439   :  { %v4333_v24 = vpop.f32.mrb[23].mxu0 }
0x143c   :  { %v5190_v25 = vpop.f32.mrb[24].mxu1  ;;  %v2403_v10 = vpop.f32.mrb[24].mxu0 }
0x143d   :  { %v2485_v27 = vmul.f32 0.35355338, %v2403_v10  ;;  %v4338_v29 = vpop.f32.mrb[25].mxu1  ;;  %v4343_v30 = vpop.f32.mrb[25].mxu0 }
0x143f   :  { %v2487_v32 = vadd.f32 %v5195_v31, %v2485_v27 }
0x1440   :  { %v2481_v33 = vpop.f32.mrb[26].mxu1 }
0x1441   :  { %v2486_v34 = vmul.f32 0.35355338, %v2481_v33  ;;  %v4348_v26 = vpop.f32.mrb[27].mxu1  ;;  %v2489_v35 = vsel %vm152_vm2, %v2487_v32, -inf }
0x1442   :  { %2490 = vmax.xlane.f32.xlu0 %v2489_v35 }
0x1443   :  { %v2488_v37 = vadd.f32 %v5202_v36, %v2486_v34 }
0x1445   :  { %v2492_v38 = vsel %vm152_vm2, %v2488_v37, -inf }
0x1446   :  { %2493 = vmax.xlane.f32.xlu1 %v2492_v38 }
0x1457   :  { %2511 = vrot.lane.b32.xlu1 %v5136_v48, %s4701_s0 }
0x1458   :  { %2587 = vrot.lane.b32.xlu0 %v5132_v46, %s4701_s0  ;;  %s5497_s0 = smov 72  }
0x145b   :  { %2665 = vrot.lane.b32.xlu1 %v5136_v48, %s5494_s23 }
0x145f   :  { %2743 = vrot.lane.b32.xlu1 %v5132_v46, %s5494_s23 }
0x1463   :  { %2741 = vrot.lane.b32.xlu1 %v5132_v46, %s5495_s24 }
0x14cf   :  { %v2491_v39 = vpop.xlane.xlu0 %2490 }
0x14d0   :  { %v2495_v40 = vsub.f32 %v2487_v32, %v2491_v39 }
0x14d2   :  { %v2497_v41 = vmul.f32 1.442695, %v2495_v40 }
0x14d3   :  { %v2588_v9 = vpop.permute.xlu0 %2587  ;;  %v2494_v28 = vpop.xlane.xlu1 %2493 }
0x14d4   :  { %4637 = vpow2.f32 %v2497_v41  ;;  %v2496_v42 = vsub.f32 %v2488_v37, %v2494_v28  ;;  %4355 = vmatpush3.msra.mxu1 %v2588_v9 }
0x14d5   :  { %4364 = vmatprep.subr.mxu1 %v4695_v8 }
0x14d6   :  { %v2499_v43 = vmul.f32 1.442695, %v2496_v42 }
0x14d7   :  { %v2512_v50 = vpop.permute.xlu1 %2511 }
0x14d8   :  { %4639 = vpow2.f32 %v2499_v43  ;;  %4350 = vmatpush3.msra.mxu0 %v2512_v50 }
0x14d9   :  { %4359 = vmatprep.subr.mxu0 %v4695_v8 }
0x14db   :  { %v2666_v59 = vpop.permute.xlu1 %2665 }
0x14de   :  { %v4638_v51 = vpop.eup %4637 }
0x14df   :  { %v2501_v54 = vsel %vm152_vm2, %v4638_v51, 0.0  ;;  %v2744_v63 = vpop.permute.xlu1 %2743 }
0x14e0   :  { %2502 = vadd.xlane.f32.xlu0 %v2501_v54 }
0x14e2   :  { %v4640_v55 = vpop.eup %4639 }
0x14e3   :  { %v2504_v56 = vsel %vm152_vm2, %v4640_v55, 0.0  ;;  %v2742_v1 = vpop.permute.xlu1 %2741 }
0x14e4   :  { %2505 = vadd.xlane.f32.xlu0 %v2504_v56 }
0x14fa   :  { %2663 = vrot.lane.b32.xlu0 %v5136_v48, %s5495_s24 }
0x156d   :  { %v2503_v57 = vpop.xlane.xlu0 %2502 }
0x156e   :  { %4641 = vrcp.f32 %v2503_v57 }
0x1571   :  { %v2506_v58 = vpop.xlane.xlu0 %2505 }
0x1572   :  { %4643 = vrcp.f32 %v2506_v58 }
0x1575   :  { %v2664_v0 = vpop.permute.xlu0 %2663 }
0x1578   :  { %v4642_v60 = vpop.eup %4641 }
0x1579   :  { %v2508_v61 = vmul.f32 %v4642_v60, %v4638_v51 }
0x157b   :  { %4352 = vmatmul.mubr.msk.f32.vlgmr.msra.gmra.mrb[26].mxu0 %vm152_vm2, %v2508_v61 }
0x157c   :  { %v4644_v62 = vpop.eup %4643  ;;  %4360 = vmatpush3.xpose.msk.msra.mxu0 %vm152_vm2, %v2666_v59  ;;  %4361 = vmatprep.mubr.msk.f32.mxu0 %vm4696_vm1, %v4695_v8 }
0x157d   :  { %v2510_v14 = vmul.f32 %v4644_v62, %v4640_v55  ;;  %4369 = vmatprep.subr.mxu0 %v4695_v8 }
0x157f   :  { %4357 = vmatmul.mubr.msk.f32.vlgmr.msra.gmra.mrb[28].mxu1 %vm152_vm2, %v2510_v14  ;;  %4362 = vmatmul.mubr.msk.f32.vlgmr.msra.gmra.mrb[28].mxu0 %vm152_vm2, %v2664_v0 }
0x1580   :  { %4365 = vmatpush3.xpose.msk.msra.mxu1 %vm152_vm2, %v2744_v63  ;;  %4366 = vmatprep.mubr.msk.f32.mxu1 %vm4696_vm1, %v4695_v8 }
0x1581   :  { %4374 = vmatprep.subr.mxu1 %v4695_v8  ;;  %4371 = vmatprep.mubr.msk.f32.mxu0 %vm4696_vm1, %v4695_v8 }
0x1583   :  { %4367 = vmatmul.mubr.msk.f32.vlgmr.msra.gmra.mrb[30].mxu1 %vm152_vm2, %v2742_v1 }
0x1584   :  { %4376 = vmatprep.mubr.msk.f32.mxu1 %vm4696_vm1, %v4695_v8 }
0x164e   :  { %v5238_v2 = vpop.f32.mrb[26].mxu0 }
0x164f   :  { %v4353_v19 = vpop.f32.mrb[27].mxu0 }
0x1652   :  { %v5240_v3 = vpop.f32.mrb[28].mxu1  ;;  %v2737_v49 = vpop.f32.mrb[28].mxu0 }
0x1653   :  { %v2819_v4 = vmul.f32 0.35355338, %v2737_v49  ;;  %v4358_v6 = vpop.f32.mrb[29].mxu1  ;;  %v4363_v47 = vpop.f32.mrb[29].mxu0 }
0x1655   :  { %v2821_v11 = vadd.f32 %v5195_v31, %v2819_v4 }
0x1656   :  { %v2815_v12 = vpop.f32.mrb[30].mxu1 }
0x1657   :  { %v2820_v13 = vmul.f32 0.35355338, %v2815_v12  ;;  %v4368_v15 = vpop.f32.mrb[31].mxu1  ;;  %v2823_v16 = vsel %vm152_vm2, %v2821_v11, -inf }
0x1658   :  { %2824 = vmax.xlane.f32.xlu0 %v2823_v16 }
0x1659   :  { %v2822_v17 = vadd.f32 %v5202_v36, %v2820_v13 }
0x165b   :  { %v2826_v18 = vsel %vm152_vm2, %v2822_v17, -inf }
0x165c   :  { %2827 = vmax.xlane.f32.xlu1 %v2826_v18 }
0x166d   :  { %2845 = vrot.lane.b32.xlu1 %v5136_v48, %s5496_s2 }
0x166e   :  { %2921 = vrot.lane.b32.xlu0 %v5132_v46, %s5496_s2 }
0x1671   :  { %2999 = vrot.lane.b32.xlu1 %v5136_v48, %s5497_s0 }
0x1675   :  { %3077 = vrot.lane.b32.xlu1 %v5132_v46, %s5497_s0 }
0x1679   :  { %3075 = vrot.lane.b32.xlu1 %v5132_v46, %s5498_s25 }
0x16e5   :  { %v2825_v20 = vpop.xlane.xlu0 %2824 }
0x16e6   :  { %v2829_v21 = vsub.f32 %v2821_v11, %v2825_v20  ;;  %v4006_v20 = vld [vmem:[%s5456_s4 + $0x30] sm:$0xff] }
0x16e8   :  { %v2831_v22 = vmul.f32 1.442695, %v2829_v21  ;;  %v4007_v21 = vld [vmem:[%s5456_s4 + $0x38] sm:$0xff] }
0x16e9   :  { %v2922_v23 = vpop.permute.xlu0 %2921  ;;  %v2828_v7 = vpop.xlane.xlu1 %2827 }
0x16ea   :  { %4645 = vpow2.f32 %v2831_v22  ;;  %v2830_v24 = vsub.f32 %v2822_v17, %v2828_v7  ;;  %4375 = vmatpush3.msra.mxu1 %v2922_v23  ;;  %v4005_v17 = vld [vmem:[%s5456_s4 + $0x28] sm:$0xff]  ;;  %v4522_v22 = vpack.c.bf16 %v4007_v21, %v4006_v20  ;;  %v4013_v20 = vld [vmem:[%s5458_s6 + $0x1] ss:$0 sm:$0xff] }
0x16eb   :  { %4384 = vmatprep.subr.mxu1 %v4695_v8 }
0x16ec   :  { %v2833_v10 = vmul.f32 1.442695, %v2830_v24 }
0x16ed   :  { %v2846_v27 = vpop.permute.xlu1 %2845 }
0x16ee   :  { %4647 = vpow2.f32 %v2833_v10  ;;  %4370 = vmatpush3.msra.mxu0 %v2846_v27 }
0x16ef   :  { %4379 = vmatprep.subr.mxu0 %v4695_v8 }
0x16f1   :  { %v3000_v35 = vpop.permute.xlu1 %2999 }
0x16f4   :  { %v4646_v29 = vpop.eup %4645 }
0x16f5   :  { %v2835_v30 = vsel %vm152_vm2, %v4646_v29, 0.0  ;;  %v3078_v40 = vpop.permute.xlu1 %3077 }
0x16f6   :  { %2836 = vadd.xlane.f32.xlu0 %v2835_v30 }
0x16f8   :  { %v4648_v32 = vpop.eup %4647 }
0x16f9   :  { %v2838_v33 = vsel %vm152_vm2, %v4648_v32, 0.0  ;;  %v3076_v28 = vpop.permute.xlu1 %3075 }
0x16fa   :  { %2839 = vadd.xlane.f32.xlu0 %v2838_v33 }
0x1710   :  { %2997 = vrot.lane.b32.xlu0 %v5136_v48, %s5498_s25 }
0x1783   :  { %v2837_v34 = vpop.xlane.xlu0 %2836 }
0x1784   :  { %4649 = vrcp.f32 %v2837_v34 }
0x1787   :  { %v2840_v26 = vpop.xlane.xlu0 %2839 }
0x1788   :  { %4651 = vrcp.f32 %v2840_v26 }
0x178b   :  { %v2998_v9 = vpop.permute.xlu0 %2997 }
0x178e   :  { %v4650_v37 = vpop.eup %4649 }
0x178f   :  { %v2842_v38 = vmul.f32 %v4650_v37, %v4646_v29 }
0x1791   :  { %4372 = vmatmul.mubr.msk.f32.vlgmr.msra.gmra.mrb[30].mxu0 %vm152_vm2, %v2842_v38 }
0x1792   :  { %v4652_v39 = vpop.eup %4651  ;;  %4380 = vmatpush3.xpose.msk.msra.mxu0 %vm152_vm2, %v3000_v35  ;;  %4381 = vmatprep.mubr.msk.f32.mxu0 %vm4696_vm1, %v4695_v8 }
0x1793   :  { %v2844_v41 = vmul.f32 %v4652_v39, %v4648_v32  ;;  %4389 = vmatprep.subr.mxu0 %v4695_v8 }
0x1795   :  { %4377 = vmatmul.mubr.msk.f32.vlgmr.msra.gmra.mrb[32].mxu1 %vm152_vm2, %v2844_v41  ;;  %4382 = vmatmul.mubr.msk.f32.vlgmr.msra.gmra.mrb[32].mxu0 %vm152_vm2, %v2998_v9 }
0x1796   :  { %4385 = vmatpush3.xpose.msk.msra.mxu1 %vm152_vm2, %v3078_v40  ;;  %4386 = vmatprep.mubr.msk.f32.mxu1 %vm4696_vm1, %v4695_v8 }
0x1797   :  { %4394 = vmatprep.subr.mxu1 %v4695_v8  ;;  %4391 = vmatprep.mubr.msk.f32.mxu0 %vm4696_vm1, %v4695_v8 }
0x1799   :  { %4387 = vmatmul.mubr.msk.f32.vlgmr.msra.gmra.mrb[34].mxu1 %vm152_vm2, %v3076_v28 }
0x179a   :  { %4396 = vmatprep.mubr.msk.f32.mxu1 %vm4696_vm1, %v4695_v8 }
0x1864   :  { %v2917_v42 = vpop.f32.mrb[30].mxu0 }
0x1865   :  { %v4373_v43 = vpop.f32.mrb[31].mxu0 }
0x1868   :  { %v2993_v50 = vpop.f32.mrb[32].mxu1  ;;  %v3071_v51 = vpop.f32.mrb[32].mxu0 }
0x1869   :  { %v3153_v54 = vmul.f32 0.35355338, %v3071_v51  ;;  %v4378_v55 = vpop.f32.mrb[33].mxu1  ;;  %v4383_v56 = vpop.f32.mrb[33].mxu0 }
0x186b   :  { %v3155_v57 = vadd.f32 %v5195_v31, %v3153_v54 }
0x186c   :  { %v3149_v58 = vpop.f32.mrb[34].mxu1 }
0x186d   :  { %v3154_v59 = vmul.f32 0.35355338, %v3149_v58  ;;  %v4388_v60 = vpop.f32.mrb[35].mxu1  ;;  %v3157_v61 = vsel %vm152_vm2, %v3155_v57, -inf }
0x186e   :  { %3158 = vmax.xlane.f32.xlu0 %v3157_v61 }
0x186f   :  { %v3156_v62 = vadd.f32 %v5202_v36, %v3154_v59 }
0x1871   :  { %v3160_v63 = vsel %vm152_vm2, %v3156_v62, -inf }
0x1872   :  { %3161 = vmax.xlane.f32.xlu1 %v3160_v63 }
0x1883   :  { %3179 = vrot.lane.b32.xlu1 %v5136_v48, %s5499_s20 }
0x1887   :  { %3333 = vrot.lane.b32.xlu1 %v5238_v2, %s5500_s26 }
0x188b   :  { %3335 = vrot.lane.b32.xlu1 %v5240_v3, %s5500_s26 }
0x188f   :  { %3343 = vrot.lane.b32.xlu1 %v2993_v50, %s5501_s19 }
0x18fb   :  { %v3159_v31 = vpop.xlane.xlu0 %3158 }
0x18fc   :  { %v3163_v14 = vsub.f32 %v3155_v57, %v3159_v31  ;;  %v4016_v31 = vld [vmem:[%s5459_s7 + $0x30] sm:$0xff] }
0x18fe   :  { %v3165_v0 = vmul.f32 1.442695, %v3163_v14  ;;  %v4017_v14 = vld [vmem:[%s5459_s7 + $0x38] sm:$0xff] }
0x18ff   :  { %v3162_v1 = vpop.xlane.xlu1 %3161 }
0x1900   :  { %4653 = vpow2.f32 %v3165_v0  ;;  %v3164_v36 = vsub.f32 %v3156_v62, %v3162_v1  ;;  %v4015_v62 = vld [vmem:[%s5459_s7 + $0x28] sm:$0xff]  ;;  %v4530_v0 = vpack.c.bf16 %v4017_v14, %v4016_v31  ;;  %v4022_v1 = vld [vmem:[%s5461_s9 + $0x40] sm:$0xff]  ;;  %v3744_v31 = vld [vmem:[%s5465_s13 + $0x18] sm:$0xff]  ;;  %v4712_v14 = vmov 0.0|0.0  }
0x1902   :  { %v3167_v19 = vmul.f32 1.442695, %v3164_v36  ;;  %v4023_v36 = vld [vmem:[%s5461_s9 + $0x48] sm:$0xff] }
0x1903   :  { %v3180_v49 = vpop.permute.xlu1 %3179 }
0x1904   :  { %4655 = vpow2.f32 %v3167_v19  ;;  %4390 = vmatpush3.msra.mxu0 %v3180_v49  ;;  %v4024_v19 = vld [vmem:[%s5461_s9 + $0x50] sm:$0xff]  ;;  %v4534_v49 = vpack.c.bf16 %v4023_v36, %v4022_v1 }
0x1907   :  { %v3334_v27 = vpop.permute.xlu1 %3333 }
0x1908   :  { %v3355_v32 = vsel %vm152_vm2, %v5188_v5, %v3334_v27  ;;  %v4028_v27 = vld [vmem:[%s5461_s9 + $0x70] sm:$0xff] }
0x190a   :  { %v4654_v4 = vpop.eup %4653 }
0x190b   :  { %v3169_v48 = vsel %vm152_vm2, %v4654_v4, 0.0  ;;  %v3336_v29 = vpop.permute.xlu1 %3335 }
0x190c   :  { %3170 = vadd.xlane.f32.xlu0 %v3169_v48  ;;  %v3356_v38 = vsel %vm152_vm2, %v5190_v25, %v3336_v29  ;;  %v4029_v29 = vld [vmem:[%s5461_s9 + $0x78] sm:$0xff] }
0x190e   :  { %v4656_v2 = vpop.eup %4655 }
0x190f   :  { %v3172_v6 = vsel %vm152_vm2, %v4656_v2, 0.0  ;;  %v3344_v33 = vpop.permute.xlu1 %3343 }
0x1910   :  { %3173 = vadd.xlane.f32.xlu0 %v3172_v6  ;;  %v3358_v39 = vsel %vm1522_vm3, %v3356_v38, %v3344_v33  ;;  %v4027_v6 = vld [vmem:[%s5461_s9 + $0x68] sm:$0xff] }
0x1926   :  { %3255 = vrot.lane.b32.xlu0 %v5132_v46, %s5499_s20  ;;  %v4004_v46 = vld [vmem:[%s5456_s4 + $0x20] sm:$0xff] }
0x1927   :  { %v4518_v18 = vpack.c.bf16 %v4005_v17, %v4004_v46  ;;  %v4012_v17 = vld [vmem:[%s5457_s5 + $0x1] ss:$0 sm:$0xff] }
0x1929   :  { %4519 = vmatprep.subr.bf16.mxu0 %v4518_v18 }
0x192a   :  { %3341 = vrot.lane.b32.xlu0 %v2917_v42, %s5501_s19 }
0x1999   :  { %v3171_v3 = vpop.xlane.xlu0 %3170 }
0x199a   :  { %4657 = vrcp.f32 %v3171_v3 }
0x199d   :  { %v3174_v47 = vpop.xlane.xlu0 %3173 }
0x199e   :  { %4659 = vrcp.f32 %v3174_v47 }
0x19a1   :  { %v3256_v11 = vpop.permute.xlu0 %3255 }
0x19a2   :  { %4395 = vmatpush3.msra.mxu1 %v3256_v11 }
0x19a4   :  { %v4658_v12 = vpop.eup %4657 }
0x19a5   :  { %v3176_v13 = vmul.f32 %v4658_v12, %v4654_v4  ;;  %v3342_v30 = vpop.permute.xlu0 %3341  ;;  %v4025_v4 = vld [vmem:[%s5461_s9 + $0x58] sm:$0xff] }
0x19a6   :  { %v3357_v34 = vsel %vm1522_vm3, %v3355_v32, %v3342_v30  ;;  %v4538_v48 = vpack.c.bf16 %v4025_v4, %v4024_v19  ;;  %v4546_v30 = vpack.c.bf16 %v4029_v29, %v4028_v27  ;;  %v4019_v32 = vld [vmem:[%s5460_s8 + $0x1] ss:$0 sm:$0xff] }
0x19a7   :  { %4392 = vmatmul.mubr.msk.f32.vlgmr.msra.gmra.mrb[34].mxu0 %vm152_vm2, %v3176_v13 }
0x19a8   :  { %v4660_v15 = vpop.eup %4659  ;;  %4521 = vmatpush3.bf16.msra.mxu0 %v4518_v18 }
0x19a9   :  { %v3178_v16 = vmul.f32 %v4660_v15, %v4656_v2  ;;  %4523 = vmatprep.subr.bf16.mxu0 %v4522_v22  ;;  %v4026_v2 = vld [vmem:[%s5461_s9 + $0x60] sm:$0xff] }
0x19aa   :  { %v4542_v3 = vpack.c.bf16 %v4027_v6, %v4026_v2  ;;  %v4036_v6 = vld [vmem:[%s5463_s11 + $0x1] ss:$0 sm:$0xff] }
0x19ab   :  { %4397 = vmatmul.mubr.msk.f32.vlgmr.msra.gmra.mrb[36].mxu1 %vm152_vm2, %v3178_v16 }
0x19ac   :  { %4525 = vmatpush3.bf16.msra.mxu0 %v4522_v22 }
0x19ad   :  { %4535 = vmatprep.subr.bf16.mxu0 %v4534_v49 }
0x1a7a   :  { %v3251_v23 = vpop.f32.mrb[34].mxu0 }
0x1a7b   :  { %3349 = vrot.lane.b32.xlu0 %v3251_v23, %s5502_s29  ;;  %v4393_v7 = vpop.f32.mrb[35].mxu0 }
0x1a7e   :  { %v3327_v24 = vpop.f32.mrb[36].mxu1 }
0x1a7f   :  { %3351 = vrot.lane.b32.xlu1 %v3327_v24, %s5502_s29  ;;  %v4398_v10 = vpop.f32.mrb[37].mxu1 }
0x1aed   :  { %v3350_v26 = vpop.permute.xlu0 %3349 }
0x1aee   :  { %v3359_v35 = vsel %vm1525_vm4, %v3357_v34, %v3350_v26 }
0x1aef   :  { %v3361_v37 = vmul.f32 %v3359_v35, %v5020_v52 }
0x1af1   :  { %4407 = vmatprep.mubr.msk.f32.mxu0 %vm67_vm0, %v3361_v37  ;;  %v3352_v40 = vpop.permute.xlu1 %3351 }
0x1af2   :  { %v3360_v41 = vsel %vm1525_vm4, %v3358_v39, %v3352_v40  ;;  %v4031_v39 = vld [vmem:[%s5462_s10 + $0x1] ss:$0 sm:$0xff] }
0x1af3   :  { %v3362_v5 = vmul.f32 %v3360_v41, %v5022_v53 }
0x1af5   :  { %4408 = vmatmul.mubr.msk.f32.vlgmr.msra.gmra.mrb[36].mxu0 %vm67_vm0, %v3362_v5 }
0x1af6   :  { %4537 = vmatpush3.bf16.msra.mxu0 %v4534_v49 }
0x1af7   :  { %4539 = vmatprep.subr.bf16.mxu0 %v4538_v48 }
0x1afa   :  { %4541 = vmatpush3.bf16.msra.mxu0 %v4538_v48 }
0x1afb   :  { %4543 = vmatprep.subr.bf16.mxu0 %v4542_v3 }
0x1afe   :  { %4545 = vmatpush3.bf16.msra.mxu0 %v4542_v3 }
0x1aff   :  { %4547 = vmatprep.subr.bf16.mxu0 %v4546_v30 }
0x1b02   :  { %4549 = vmatpush3.bf16.msra.mxu0 %v4546_v30  ;;  %v3836_v30 = vld [vmem:[%s5467_s15 + $0x30] sm:$0xff] }
0x1bc8   :  { %v4409_v9 = vpop.f32.mrb[36].mxu0 }
0x1bc9   :  { %v3450_v28 = vadd.f32 %v4409_v9, %v5124_v45  ;;  %v3440_v42 = vpop.f32.mrb[37].mxu0 }
0x1bca   :  { %v3449_v43 = vadd.f32 %v3440_v42, %v5121_v44  ;;  %v4014_v44 = vld [vmem:[%s5459_s7 + $0x20] sm:$0xff] }
0x1bcb   :  { %v3458_v50 = vsel %vm67_vm0, %v3450_v28, 0.0  ;;  %v4526_v63 = vpack.c.bf16 %v4015_v62, %v4014_v44  ;;  %v3742_v44 = vld [vmem:[%s5465_s13 + $0x8] sm:$0xff] }
0x1bcc   :  { %3459 = vadd.xlane.f32.xlu1 %v3458_v50  ;;  %v3455_v25 = vsel %vm67_vm0, %v3449_v43, 0.0 }
0x1bcd   :  { %3456 = vadd.xlane.f32.xlu0 %v3455_v25  ;;  %4527 = vmatprep.subr.bf16.mxu1 %v4526_v63 }
0x1bce   :  { %4529 = vmatpush3.bf16.msra.mxu1 %v4526_v63  ;;  %v3743_v63 = vld [vmem:[%s5465_s13 + $0x10] sm:$0xff] }
0x1bcf   :  { %4531 = vmatprep.subr.bf16.mxu1 %v4530_v0 }
0x1bd2   :  { %4533 = vmatpush3.bf16.msra.mxu1 %v4530_v0  ;;  %v4554_v0 = vpack.c.bf16 %v3744_v31, %v3743_v63 }
0x1bd3   :  { %4550 = vmatprep.subr.bf16.mxu1 %v4712_v14 }
0x1c59   :  { %v3460_v51 = vpop.xlane.xlu1 %3459 }
0x1c5a   :  { %v3462_v54 = vmul.f32 0.03125, %v3460_v51  ;;  %v3457_v55 = vpop.xlane.xlu0 %3456 }
0x1c5b   :  { %v3461_v56 = vmul.f32 0.03125, %v3457_v55 }
0x1c5c   :  { %v3464_v57 = vsub.f32 %v3450_v28, %v3462_v54 }
0x1c5d   :  { %v3463_v58 = vsub.f32 %v3449_v43, %v3461_v56 }
0x1c5e   :  { %v3466_v61 = vmul.f32 %v3464_v57, %v3464_v57 }
0x1c5f   :  { %v3465_v59 = vmul.f32 %v3463_v58, %v3463_v58 }
0x1c60   :  { %v3470_v45 = vsel %vm67_vm0, %v3466_v61, 0.0 }
0x1c61   :  { %v3467_v60 = vsel %vm67_vm0, %v3465_v59, 0.0 }
0x1c62   :  { %3468 = vadd.xlane.f32.xlu0 %v3467_v60 }
0x1c66   :  { %3471 = vadd.xlane.f32.xlu0 %v3470_v45  ;;  %v3741_v45 = vld [vmem:[%s5465_s13] sm:$0xff] }
0x1c67   :  { %v4551_v62 = vpack.c.bf16 %v3742_v44, %v3741_v45 }
0x1cef   :  { %v3469_v47 = vpop.xlane.xlu0 %3468 }
0x1cf0   :  { %v3473_v11 = vmul.f32 0.03125, %v3469_v47 }
0x1cf2   :  { %v3475_v12 = vadd.f32 1e-05, %v3473_v11 }
0x1cf3   :  { %v3472_v13 = vpop.xlane.xlu0 %3471 }
0x1cf4   :  { %4661 = vrsqrt.f32 %v3475_v12  ;;  %v3474_v15 = vmul.f32 0.03125, %v3472_v13  ;;  %v4037_v12 = vld [vmem:[%s5464_s12 + $0x1] ss:$0 sm:$0xff] }
0x1cf6   :  { %v3476_v16 = vadd.f32 1e-05, %v3474_v15 }
0x1cf8   :  { %4663 = vrsqrt.f32 %v3476_v16 }
0x1cfe   :  { %v4662_v46 = vpop.eup %4661 }
0x1cff   :  { %v3479_v18 = vmul.f32 %v4662_v46, %v3463_v58 }
0x1d01   :  { %v3487_v21 = vmul.f32 %v4012_v17, %v3479_v18  ;;  %v3831_v18 = vld [vmem:[%s5467_s15 + $0x8] sm:$0xff] }
0x1d02   :  { %v4664_v22 = vpop.eup %4663 }
0x1d03   :  { %v3480_v23 = vmul.f32 %v4664_v22, %v3464_v57  ;;  %v3495_v7 = vadd.f32 %v4013_v20, %v3487_v21 }
0x1d05   :  { %v3488_v24 = vmul.f32 %v4012_v17, %v3480_v23  ;;  %4418 = vmatprep.mubr.msk.f32.mxu1 %vm67_vm0, %v3495_v7  ;;  %v3830_v17 = vld [vmem:[%s5467_s15] sm:$0xff] }
0x1d06   :  { %v4557_v23 = vpack.c.bf16 %v3831_v18, %v3830_v17 }
0x1d07   :  { %v3496_v10 = vadd.f32 %v4013_v20, %v3488_v24  ;;  %v3833_v24 = vld [vmem:[%s5467_s15 + $0x18] sm:$0xff] }
0x1d09   :  { %4419 = vmatmul.mubr.msk.f32.vlgmr.msra.gmra.mrb[38].mxu1 %vm67_vm0, %v3496_v10 }
0x1d0a   :  { %4448 = vmatprep.mubr.msk.f32.mxu1 %vm4696_vm1, %v4695_v8  ;;  %4552 = vmatpush3.bf16.msra.mxu1 %v4551_v62 }
0x1d0b   :  { %4553 = vmatprep.subr.bf16.mxu1 %v4712_v14 }
0x1d0e   :  { %4555 = vmatpush3.bf16.msra.mxu1 %v4554_v0 }
0x1d0f   :  { %4556 = vmatprep.subr.bf16.mxu1 %v4712_v14 }
0x1ddc   :  { %v4420_v33 = vpop.f32.mrb[38].mxu1 }
0x1ddd   :  { %v3588_v34 = vadd.f32 %v4420_v33, %v4019_v32  ;;  %v3582_v26 = vpop.f32.mrb[39].mxu1  ;;  %v4038_v33 = vld [vmem:[%s5466_s14] ss:$0 sm:$0xff] }
0x1dde   :  { %v3583_v35 = vadd.f32 %v4019_v32, %v3582_v26 }
0x1ddf   :  { %v3592_v38 = vmax.f32 %v3588_v34, 0.0 }
0x1de0   :  { %v3591_v37 = vmax.f32 %v3583_v35, 0.0 }
0x1de2   :  { %4437 = vmatprep.mubr.msk.f32.mxu0 %vm1781_vm5, %v3591_v37 }
0x1de3   :  { %4438 = vmatmul.mubr.msk.f32.vlgmr.msra.gmra.mrb[38].mxu0 %vm1781_vm5, %v3592_v38  ;;  %v4040_v38 = vld [vmem:[%s5468_s16] ss:$0 sm:$0xff] }
0x1eb6   :  { %v4439_v40 = vpop.f32.mrb[38].mxu0 }
0x1eb7   :  { %v3688_v41 = vadd.f32 %v4439_v40, %v4031_v39  ;;  %v3682_v5 = vpop.f32.mrb[39].mxu0 }
0x1eb8   :  { %v3683_v9 = vadd.f32 %v4031_v39, %v3682_v5 }
0x1eb9   :  { %v3692_v28 = vadd.f32 %v3688_v41, %v3496_v10 }
0x1eba   :  { %v3691_v42 = vadd.f32 %v3683_v9, %v3495_v7  ;;  %v3832_v7 = vld [vmem:[%s5467_s15 + $0x10] sm:$0xff] }
0x1ebb   :  { %v3700_v43 = vsel %vm67_vm0, %v3692_v28, 0.0  ;;  %v4560_v27 = vpack.c.bf16 %v3833_v24, %v3832_v7 }
0x1ebc   :  { %3701 = vadd.xlane.f32.xlu1 %v3700_v43  ;;  %v3697_v50 = vsel %vm67_vm0, %v3691_v42, 0.0 }
0x1ebd   :  { %3698 = vadd.xlane.f32.xlu0 %v3697_v50 }
0x1f49   :  { %v3702_v25 = vpop.xlane.xlu1 %3701 }
0x1f4a   :  { %v3704_v51 = vmul.f32 0.03125, %v3702_v25  ;;  %v3699_v54 = vpop.xlane.xlu0 %3698 }
0x1f4b   :  { %v3703_v55 = vmul.f32 0.03125, %v3699_v54 }
0x1f4c   :  { %v3706_v56 = vsub.f32 %v3692_v28, %v3704_v51 }
0x1f4d   :  { %v3705_v57 = vsub.f32 %v3691_v42, %v3703_v55 }
0x1f4e   :  { %v3708_v58 = vmul.f32 %v3706_v56, %v3706_v56 }
0x1f4f   :  { %v3707_v59 = vmul.f32 %v3705_v57, %v3705_v57 }
0x1f50   :  { %v3712_v60 = vsel %vm67_vm0, %v3708_v58, 0.0 }
0x1f51   :  { %3713 = vadd.xlane.f32.xlu1 %v3712_v60  ;;  %v3709_v61 = vsel %vm67_vm0, %v3707_v59, 0.0 }
0x1f52   :  { %3710 = vadd.xlane.f32.xlu0 %v3709_v61 }
0x1fde   :  { %v3714_v1 = vpop.xlane.xlu1 %3713 }
0x1fdf   :  { %v3716_v36 = vmul.f32 0.03125, %v3714_v1  ;;  %v3711_v19 = vpop.xlane.xlu0 %3710 }
0x1fe0   :  { %v3715_v49 = vmul.f32 0.03125, %v3711_v19 }
0x1fe1   :  { %v3718_v4 = vadd.f32 1e-05, %v3716_v36 }
0x1fe2   :  { %v3717_v48 = vadd.f32 1e-05, %v3715_v49 }
0x1fe3   :  { %4665 = vrsqrt.f32 %v3718_v4 }
0x1fe4   :  { %4667 = vrsqrt.f32 %v3717_v48 }
0x1fed   :  { %v4666_v2 = vpop.eup %4665 }
0x1fee   :  { %v4668_v3 = vpop.eup %4667  ;;  %v3722_v47 = vmul.f32 %v4666_v2, %v3706_v56 }
0x1fef   :  { %v3721_v11 = vmul.f32 %v4668_v3, %v3705_v57 }
0x1ff0   :  { %v3730_v13 = vmul.f32 %v4036_v6, %v3722_v47 }
0x1ff1   :  { %v3729_v15 = vmul.f32 %v4036_v6, %v3721_v11 }
0x1ff2   :  { %v3738_v16 = vadd.f32 %v4037_v12, %v3730_v13 }
0x1ff3   :  { %v3737_v46 = vadd.f32 %v4037_v12, %v3729_v15 }
0x1ff4   :  { %v3740_v20 = vmul.f32 %v3738_v16, %v5022_v53  ;;  %v3835_v53 = vld [vmem:[%s5467_s15 + $0x28] sm:$0xff] }
0x1ff5   :  { %v3739_v21 = vmul.f32 %v3737_v46, %v5020_v52  ;;  %v3834_v52 = vld [vmem:[%s5467_s15 + $0x20] sm:$0xff] }
0x1ff6   :  { %v3754_v22 = vrot.slane %v3740_v20, 7  ;;  %v4563_v29 = vpack.c.bf16 %v3835_v53, %v3834_v52 }
0x1ff8   :  { %v3756_v10 = vsel %vm3755_vm6, %v3754_v22, %v3739_v21 }
0x1ff9   :  { %4449 = vmatmul.mubr.msk.f32.vlgmr.msra.gmra.mrb[40].mxu1 %vm67_vm0, %v3756_v10 }
0x1ffa   :  { %4558 = vmatpush3.bf16.msra.mxu1 %v4557_v23  ;;  %4467 = vmatprep.mubr.msk.f32.mxu1 %vm4696_vm1, %v4695_v8  ;;  %v3837_v8 = vld [vmem:[%s5467_s15 + $0x38] sm:$0xff]  ;;  %s4671_s15 = scalar_lea.vmem %s3927_s22, 32 }
0x1ffb   :  { %4559 = vmatprep.subr.bf16.mxu1 %v4712_v14  ;;  %v4566_v32 = vpack.c.bf16 %v3837_v8, %v3836_v30  ;;  %p4672_p0 = scmp.ne.s32.totalorder %s3927_s22, %s4671_s15  ;;  %p4677_p2 = scmp.lt.s32.totalorder %s4671_s15, %s4671_s15 }
0x1ffd   :  { %p4678_p3 = por %p4677_p2, %p4676_p1 }
0x1ffe   :  { %4561 = vmatpush3.bf16.msra.mxu1 %v4560_v27 }
0x1fff   :  { %4562 = vmatprep.subr.bf16.mxu1 %v4712_v14  ;;  %p4679_p4 = pnand %p4678_p3, %p4672_p0 }
0x2002   :  { %4564 = vmatpush3.bf16.msra.mxu1 %v4563_v29 }
0x2003   :  { %4565 = vmatprep.subr.bf16.mxu1 %v4712_v14 }
0x2006   :  { %4567 = vmatpush3.bf16.msra.mxu1 %v4566_v32 }
0x20cc   :  { %v3825_v34 = vpop.f32.mrb[40].mxu1 }
0x20cd   :  { %v3826_v26 = vadd.f32 %v4038_v33, %v3825_v34  ;;  %v4450_v35 = vpop.f32.mrb[41].mxu1 }
0x20cf   :  { %v3829_v37 = vmax.f32 %v3826_v26, 0.0 }
0x20d1   :  { %4468 = vmatmul.mubr.msk.f32.vlgmr.msra.gmra.mrb[42].mxu1 %vm1781_vm5, %v3829_v37 }
0x21a4   :  { %v3914_v39 = vpop.f32.mrb[42].mxu1 }
0x21a5   :  { %v3915_v40 = vadd.f32 %v4040_v38, %v3914_v39  ;;  %v4469_v41 = vpop.f32.mrb[43].mxu1 }
0x21a7   :  { %3919 = vst.msk [vmem:[#allocation2] sm:$0x3] %vm3918_vm7, %v3915_v40 }
0x21a8   :  { %4682 = shalt.err (!%p4679_p4)
}
0x21a9   :  { %s4683_s7 = scalar_lea.hbm %s5469_s17, 32 }
0x21aa   :  { %p4684_p5 = scmp.ne.s32.totalorder %s5469_s17, %s4683_s7  ;;  %p4687_p6 = scmp.lt.u32.totalorder %s4683_s7, %s5469_s17 }
0x21ac   :  { %p4689_p7 = pnand %p4687_p6, %p4684_p5 }
0x21ae   :  { %4692 = shalt.err (!%p4689_p7)
}
0x21af   :  { %3929 = dma.vmem_to_hbm [thread:$0]  %s3927_s22, 32, %s5469_s17, [#allocation3]  }
0x21b0   :  { %4693 = dma.done.wait [#allocation3], 32  }
0x21b1   :  { %4694 = vsyncadd [#allocation3], 4294967264 }
0x21b2   :  { %3933 = vsyncpa [#allocation3], 1 }

</bundles_post_ra>
